<compile_context>
chip_gen: v6e
topology: v6e:2x2x1
jax: 0.10.0
libtpu: 0.0.40
codegen_flags: <defaults>
</compile_context>

<pallas_src>
import functools
import math

import jax
import jax.numpy as jnp
from jax import lax
from jax.experimental import pallas as pl
from jax.experimental.pallas import tpu as pltpu

NEG_INF = -1e30          # large finite negative (== -inf masking while rows stay finite)
VMEM_LIMIT = 64 * 1024 * 1024


# ----------------------------- tiling helpers -----------------------------

def _choose_tile(dim, cap, align):
    """Largest multiple of `align` that divides `dim` and is <= cap; else full dim."""
    if dim <= cap:
        return dim
    t = (cap // align) * align
    while t >= align:
        if dim % t == 0:
            return t
        t -= align
    return dim


# ----------------------------- fused (LN +) linear (+bias/relu/residual) -----------------------------

def _linear_kernel(*refs, has_ln, has_bias, has_res, activation, eps):
    it = iter(refs)
    x_ref = next(it)
    w_ref = next(it)
    g_ref = next(it) if has_ln else None
    bln_ref = next(it) if has_ln else None
    b_ref = next(it) if has_bias else None
    r_ref = next(it) if has_res else None
    o_ref = next(it)
    acc_ref = next(it)

    @pl.when(pl.program_id(2) == 0)
    def _():
        acc_ref[...] = jnp.zeros_like(acc_ref)

    x = x_ref[...]
    if has_ln:
        # Fused pre-norm prologue (only emitted when the x tile holds the full row, K == tk).
        xf = x.astype(jnp.float32)
        mean = jnp.mean(xf, axis=-1, keepdims=True)
        cent = xf - mean
        var = jnp.mean(cent * cent, axis=-1, keepdims=True)
        x = (cent * lax.rsqrt(var + eps) * g_ref[...] + bln_ref[...]).astype(w_ref.dtype)

    acc_ref[...] += jnp.dot(x, w_ref[...], preferred_element_type=jnp.float32)

    @pl.when(pl.program_id(2) == pl.num_programs(2) - 1)
    def _():
        y = acc_ref[...]
        if has_bias:
            y = y + b_ref[...].astype(jnp.float32)
        if activation == "relu":
            y = jnp.maximum(y, 0.0)
        if has_res:
            y = y + r_ref[...].astype(jnp.float32)
        o_ref[...] = y.astype(o_ref.dtype)


def linear(x, w, b=None, residual=None, activation=None, ln=None, eps=1e-5,
           out_dtype=jnp.bfloat16, tm_cap=512, tn_cap=512, tk_cap=1024):
    """y = (LN(x) if ln else x) @ w (+ b) (+relu) (+ residual), tiled + pipelined.

    x:(M,K) bf16, w:(K,N) bf16, b:(N,) f32 or None, ln=(gamma, beta) f32 or None."""
    M, K = x.shape
    N = w.shape[1]

    if ln is not None and K > tk_cap:
        # Fallback: the row does not fit one K-tile -> separate LayerNorm pass.
        x = layernorm(x, ln[0], ln[1], eps=eps)
        ln = None

    tm = _choose_tile(M, tm_cap, 16)    # 16-row align: bf16 packs (16,128) per vreg (v5e)
    tn = _choose_tile(N, tn_cap, 128)
    tk = K if ln is not None else _choose_tile(K, tk_cap, 128)
    grid = (M // tm, N // tn, K // tk)

    has_ln = ln is not None
    has_bias = b is not None
    has_res = residual is not None

    in_specs = [pl.BlockSpec((tm, tk), lambda i, j, k: (i, k)),
                pl.BlockSpec((tk, tn), lambda i, j, k: (k, j))]
    args = [x, w]
    if has_ln:
        in_specs += [pl.BlockSpec((1, tk), lambda i, j, k: (0, k)),
                     pl.BlockSpec((1, tk), lambda i, j, k: (0, k))]
        args += [ln[0].reshape(1, K).astype(jnp.float32),
                 ln[1].reshape(1, K).astype(jnp.float32)]
    if has_bias:
        in_specs.append(pl.BlockSpec((1, tn), lambda i, j, k: (0, j)))
        args.append(b.reshape(1, N).astype(jnp.float32))
    if has_res:
        # TODO(synk): residual is only read on the last K step; single-buffering it would
        # free one (tm,tn) slot once tile caps approach the VMEM limit.
        in_specs.append(pl.BlockSpec((tm, tn), lambda i, j, k: (i, j)))
        args.append(residual)

    kernel = functools.partial(_linear_kernel, has_ln=has_ln, has_bias=has_bias,
                               has_res=has_res, activation=activation, eps=eps)
    return pl.pallas_call(
        kernel,
        out_shape=jax.ShapeDtypeStruct((M, N), out_dtype),
        grid=grid,
        in_specs=in_specs,
        out_specs=pl.BlockSpec((tm, tn), lambda i, j, k: (i, j)),
        scratch_shapes=[pltpu.VMEM((tm, tn), jnp.float32)],
        compiler_params=pltpu.CompilerParams(
            dimension_semantics=("parallel", "parallel", "arbitrary"),
            vmem_limit_bytes=VMEM_LIMIT),
    )(*args)


# ----------------------------- standalone layer norm (fallback only) -----------------------------

def _layernorm_kernel(x_ref, g_ref, b_ref, o_ref, *, eps):
    x = x_ref[...].astype(jnp.float32)
    mean = jnp.mean(x, axis=-1, keepdims=True)
    cent = x - mean
    var = jnp.mean(cent * cent, axis=-1, keepdims=True)
    xn = cent * lax.rsqrt(var + eps)
    o_ref[...] = (xn * g_ref[...] + b_ref[...]).astype(o_ref.dtype)


def layernorm(x, gamma, beta, eps=1e-5, out_dtype=jnp.bfloat16):
    M, D = x.shape
    tm = _choose_tile(M, 512, 16)
    kernel = functools.partial(_layernorm_kernel, eps=eps)
    return pl.pallas_call(
        kernel,
        out_shape=jax.ShapeDtypeStruct((M, D), out_dtype),
        grid=(M // tm,),
        in_specs=[
            pl.BlockSpec((tm, D), lambda i: (i, 0)),
            pl.BlockSpec((1, D), lambda i: (0, 0)),
            pl.BlockSpec((1, D), lambda i: (0, 0)),
        ],
        out_specs=pl.BlockSpec((tm, D), lambda i: (i, 0)),
        compiler_params=pltpu.CompilerParams(dimension_semantics=("parallel",),
                                             vmem_limit_bytes=VMEM_LIMIT),
    )(x, gamma.reshape(1, D), beta.reshape(1, D))


# ----------------------------- attention (head-parallel grid) -----------------------------

def _attention_kernel(bias_ref, q_ref, k_ref, v_ref, o_ref, *, causal):
    # q: (S, dh) bf16 (scale already folded into the Q projection), k/v: (T, dh) bf16,
    # bias: (1, T) f32 key-padding bias (0 / NEG_INF), broadcast over query rows.
    q = q_ref[...]
    k = k_ref[...]
    v = v_ref[...]
    s = lax.dot_general(q, k, (((1,), (1,)), ((), ())),
                        preferred_element_type=jnp.float32)          # (S, T)
    s = s + bias_ref[...].astype(jnp.float32)
    if causal:
        row = lax.broadcasted_iota(jnp.int32, s.shape, 0)
        col = lax.broadcasted_iota(jnp.int32, s.shape, 1)
        s = jnp.where(col > row, NEG_INF, s)
    m = jnp.max(s, axis=-1, keepdims=True)
    p = jnp.exp(s - m)
    denom = jnp.sum(p, axis=-1, keepdims=True)
    o = jnp.dot(p.astype(v.dtype), v, preferred_element_type=jnp.float32)   # (S, dh)
    o_ref[...] = (o * pl.reciprocal(denom, approx=True)).astype(o_ref.dtype)


def attention(q, k, v, key_bias, causal):
    """softmax(q k^T + key_bias [+ causal]) v with q,k,v in (B, H, S/T, dh) layout.

    grid=(B, H): lane-dense full-extent (S, dh) blocks per head, no in-kernel head
    slices, and >= B*H parallel steps (keeps both v7x TensorCores busy)."""
    B, H, S, dh = q.shape
    T = k.shape[2]
    kernel = functools.partial(_attention_kernel, causal=causal)
    return pl.pallas_call(
        kernel,
        out_shape=jax.ShapeDtypeStruct((B, H, S, dh), jnp.bfloat16),
        grid=(B, H),
        in_specs=[
            pl.BlockSpec((None, 1, T), lambda b, h: (b, 0, 0)),
            pl.BlockSpec((None, None, S, dh), lambda b, h: (b, h, 0, 0)),
            pl.BlockSpec((None, None, T, dh), lambda b, h: (b, h, 0, 0)),
            pl.BlockSpec((None, None, T, dh), lambda b, h: (b, h, 0, 0)),
        ],
        out_specs=pl.BlockSpec((None, None, S, dh), lambda b, h: (b, h, 0, 0)),
        compiler_params=pltpu.CompilerParams(
            dimension_semantics=("parallel", "parallel"),
            vmem_limit_bytes=VMEM_LIMIT),
    )(key_bias, q, k, v)


# ----------------------------- model glue -----------------------------

def _split_heads(x2d, B, S, H):
    """(B*S, d) -> (B, H, S, dh). Single XLA layout copy (slice/reshape/transpose fuse)."""
    d = x2d.shape[1]
    return x2d.reshape(B, S, H, d // H).transpose(0, 2, 1, 3)


def _merge_heads(x4d):
    """(B, H, S, dh) -> (B*S, d)."""
    B, H, S, dh = x4d.shape
    return x4d.transpose(0, 2, 1, 3).reshape(B * S, H * dh)


def decoder_layer(x2d, mem2d, p, self_key_bias, cross_key_bias, n_heads, B, S, T):
    """nn.TransformerDecoderLayer, norm_first=True, activation=relu, eval mode."""
    d = x2d.shape[1]

    # --- self attention (ln1 fused into the QKV projection; scale folded into Q weights) ---
    sa = p["self_attn"]
    qkv = linear(x2d, sa["wqkv"], sa["bqkv"], ln=(p["ln1_g"], p["ln1_b"]))      # (B*S, 3d)
    q = _split_heads(qkv[:, :d], B, S, n_heads)
    k = _split_heads(qkv[:, d:2 * d], B, S, n_heads)
    v = _split_heads(qkv[:, 2 * d:], B, S, n_heads)
    o = _merge_heads(attention(q, k, v, self_key_bias, causal=True))
    x2d = linear(o, sa["wo"], sa["bo"], residual=x2d)

    # --- cross attention (ln2 fused into the Q projection; memory is not normed, per PyTorch) ---
    ca = p["cross_attn"]
    qc = linear(x2d, ca["wq"], ca["bq"], ln=(p["ln2_g"], p["ln2_b"]))           # (B*S, d)
    kv = linear(mem2d, ca["wkv"], ca["bkv"])                                    # (B*T, 2d)
    q = _split_heads(qc, B, S, n_heads)
    k = _split_heads(kv[:, :d], B, T, n_heads)
    v = _split_heads(kv[:, d:], B, T, n_heads)
    o = _merge_heads(attention(q, k, v, cross_key_bias, causal=False))
    x2d = linear(o, ca["wo"], ca["bo"], residual=x2d)

    # --- feed forward (ln3 fused into w1, relu in the epilogue; residual fused into w2) ---
    ff = linear(x2d, p["w1"], p["b1"], activation="relu", ln=(p["ln3_g"], p["ln3_b"]))
    x2d = linear(ff, p["w2"], p["b2"], residual=x2d)
    return x2d


def decoder_forward(params, tokens, enc_out, enc_mask, token_mask, n_heads):
    """Mirror of Decoder.forward(tokens, enc_out, enc_mask, token_mask)."""
    B, S = tokens.shape
    T = enc_out.shape[1]
    d = params["pos"].shape[1]

    # token embedding lookup (gather = glue) + positional embedding, then bf16
    x = (params["embedding"][tokens] + params["pos"][:S, :]).astype(jnp.bfloat16)
    x2d = x.reshape(B * S, d)
    mem2d = enc_out.astype(jnp.bfloat16).reshape(B * T, d)

    # Only (B,1,T)-sized key-padding biases leave HBM; the causal mask is built in-kernel.
    self_key_bias = jnp.where(token_mask[:, None, :], NEG_INF, 0.0).astype(jnp.float32)   # (B,1,S)
    cross_key_bias = jnp.where(enc_mask[:, None, :], NEG_INF, 0.0).astype(jnp.float32)    # (B,1,T)

    for lp in params["layers"]:
        x2d = decoder_layer(x2d, mem2d, lp, self_key_bias, cross_key_bias, n_heads, B, S, T)

    # final LayerNorm fused into the tied-embedding logits matmul; no-bias path (no zeros DMA)
    logits = linear(x2d, params["emb_t"], b=None,
                    ln=(params["ln_f_g"], params["ln_f_b"]), out_dtype=jnp.float32)
    return logits.reshape(B, S, -1)


# ----------------------------- deterministic params -----------------------------

def init_params(key, vocab, max_seq, d_model, d_ff, n_heads, n_layers):
    keys = jax.random.split(key, 2 + n_layers)
    emb = jax.random.normal(keys[0], (vocab, d_model), jnp.float32)
    pos = 0.1 * jax.random.normal(keys[1], (max_seq, d_model), jnp.float32)

    s = 1.0 / math.sqrt(d_model)
    dh = d_model // n_heads
    att_scale = 1.0 / math.sqrt(dh)   # folded into the Q projection (weights + bias)

    def init_self_attn(k):
        ks = jax.random.split(k, 2)
        wqkv = s * jax.random.normal(ks[0], (d_model, 3 * d_model), jnp.float32)
        wqkv = wqkv.at[:, :d_model].multiply(att_scale)       # fold 1/sqrt(dh) into Q columns
        bqkv = jnp.zeros((3 * d_model,), jnp.float32)
        bqkv = bqkv.at[:d_model].multiply(att_scale)
        return {
            "wqkv": wqkv.astype(jnp.bfloat16),
            "bqkv": bqkv,
            "wo": (s * jax.random.normal(ks[1], (d_model, d_model), jnp.float32)).astype(jnp.bfloat16),
            "bo": jnp.zeros((d_model,), jnp.float32),
        }

    def init_cross_attn(k):
        ks = jax.random.split(k, 3)
        wq = att_scale * s * jax.random.normal(ks[0], (d_model, d_model), jnp.float32)
        return {
            "wq": wq.astype(jnp.bfloat16),
            "bq": jnp.zeros((d_model,), jnp.float32) * att_scale,
            "wkv": (s * jax.random.normal(ks[1], (d_model, 2 * d_model), jnp.float32)).astype(jnp.bfloat16),
            "bkv": jnp.zeros((2 * d_model,), jnp.float32),
            "wo": (s * jax.random.normal(ks[2], (d_model, d_model), jnp.float32)).astype(jnp.bfloat16),
            "bo": jnp.zeros((d_model,), jnp.float32),
        }

    layers = []
    for li in range(n_layers):
        ks = jax.random.split(keys[2 + li], 4)
        layers.append({
            "self_attn": init_self_attn(ks[0]),
            "cross_attn": init_cross_attn(ks[1]),
            "w1": (s * jax.random.normal(ks[2], (d_model, d_ff), jnp.float32)).astype(jnp.bfloat16),
            "b1": jnp.zeros((d_ff,), jnp.float32),
            "w2": ((1.0 / math.sqrt(d_ff)) * jax.random.normal(ks[3], (d_ff, d_model), jnp.float32)).astype(jnp.bfloat16),
            "b2": jnp.zeros((d_model,), jnp.float32),
            "ln1_g": jnp.ones((d_model,), jnp.float32), "ln1_b": jnp.zeros((d_model,), jnp.float32),
            "ln2_g": jnp.ones((d_model,), jnp.float32), "ln2_b": jnp.zeros((d_model,), jnp.float32),
            "ln3_g": jnp.ones((d_model,), jnp.float32), "ln3_b": jnp.zeros((d_model,), jnp.float32),
        })

    return {
        "embedding": emb,                               # (vocab, d) f32, used for gather
        "emb_t": emb.T.astype(jnp.bfloat16),            # one-time transposed copy (weight-tied logits)
        "pos": pos,
        "layers": layers,
        "ln_f_g": jnp.ones((d_model,), jnp.float32),
        "ln_f_b": jnp.zeros((d_model,), jnp.float32),
    }


# ----------------------------- main -----------------------------

if __name__ == "__main__":
    vocab_size, max_seq_length = 64, 16
    d_model, d_ff, n_dec_heads, n_dec_layers = 32, 64, 4, 2
    B, S, T_enc = 2, 8, 16

    key = jax.random.PRNGKey(0)
    kp, kt, ke = jax.random.split(key, 3)

    params = init_params(kp, vocab_size, max_seq_length, d_model, d_ff, n_dec_heads, n_dec_layers)
    tokens = jax.random.randint(kt, (B, S), 0, vocab_size, dtype=jnp.int32)
    enc_out = jax.random.normal(ke, (B, T_enc, d_model), jnp.float32)
    # PyTorch key_padding_mask convention: True = padded key position (ignored)
    token_mask = jnp.zeros((B, S), dtype=bool).at[1, -2:].set(True)
    enc_mask = jnp.zeros((B, T_enc), dtype=bool).at[0, -4:].set(True)

    fwd = jax.jit(functools.partial(decoder_forward, n_heads=n_dec_heads))
    logits = fwd(params, tokens, enc_out, enc_mask, token_mask)
    logits = jax.block_until_ready(logits)

    assert logits.shape == (B, S, vocab_size), logits.shape
    assert bool(jnp.all(jnp.isfinite(logits)))
    print("KERNEL_OK")
</pallas_src>

<mosaic_0001>
module attributes {stable_mosaic.version = 11 : i64} {
  func.func @_attention_kernel(%arg0: i32, %arg1: i32, %arg2: memref<1x1x8xf32, #tpu.memory_space<vmem>>, %arg3: memref<1x1x8x8xbf16, #tpu.memory_space<vmem>>, %arg4: memref<1x1x8x8xbf16, #tpu.memory_space<vmem>>, %arg5: memref<1x1x8x8xbf16, #tpu.memory_space<vmem>>, %arg6: memref<1x1x8x8xbf16, #tpu.memory_space<vmem>>) attributes {dimension_semantics = [#tpu.dimension_semantics<parallel>, #tpu.dimension_semantics<parallel>], iteration_bounds = array<i64: 2, 4>, scalar_prefetch = 0 : i64, scratch_operands = 0 : i64, tpu.core_type = #tpu.core_type<tc>, window_params = [{transform_indices = @transform_0, window_bounds = array<i64: 1, 1, 8>}, {transform_indices = @transform_1, window_bounds = array<i64: 1, 1, 8, 8>}, {transform_indices = @transform_2, window_bounds = array<i64: 1, 1, 8, 8>}, {transform_indices = @transform_3, window_bounds = array<i64: 1, 1, 8, 8>}, {transform_indices = @transform_4, window_bounds = array<i64: 1, 1, 8, 8>}]} {
    %c0 = arith.constant 0 : index
    %c0_0 = arith.constant 0 : index
    %c0_1 = arith.constant 0 : index
    %c0_2 = arith.constant 0 : index
    %0 = vector.load %arg3[%c0, %c0_0, %c0_1, %c0_2] : memref<1x1x8x8xbf16, #tpu.memory_space<vmem>>, vector<1x1x8x8xbf16>
    %1 = vector.shape_cast %0 : vector<1x1x8x8xbf16> to vector<8x8xbf16>
    %c0_3 = arith.constant 0 : index
    %c0_4 = arith.constant 0 : index
    %c0_5 = arith.constant 0 : index
    %c0_6 = arith.constant 0 : index
    %2 = vector.load %arg4[%c0_3, %c0_4, %c0_5, %c0_6] : memref<1x1x8x8xbf16, #tpu.memory_space<vmem>>, vector<1x1x8x8xbf16>
    %3 = vector.shape_cast %2 : vector<1x1x8x8xbf16> to vector<8x8xbf16>
    %c0_7 = arith.constant 0 : index
    %c0_8 = arith.constant 0 : index
    %c0_9 = arith.constant 0 : index
    %c0_10 = arith.constant 0 : index
    %4 = vector.load %arg5[%c0_7, %c0_8, %c0_9, %c0_10] : memref<1x1x8x8xbf16, #tpu.memory_space<vmem>>, vector<1x1x8x8xbf16>
    %5 = vector.shape_cast %4 : vector<1x1x8x8xbf16> to vector<8x8xbf16>
    %cst = arith.constant dense<0.000000e+00> : vector<8x8xf32>
    %6 = tpu.matmul %1, %3, %cst {dimension_numbers = #tpu.dot_dimension_numbers<[1], [1], [0], [0], [0, 0, 1, 0], [], []>} : vector<8x8xbf16>, vector<8x8xbf16>, vector<8x8xf32> -> vector<8x8xf32>
    %c0_11 = arith.constant 0 : index
    %c0_12 = arith.constant 0 : index
    %c0_13 = arith.constant 0 : index
    %7 = vector.load %arg2[%c0_11, %c0_12, %c0_13] : memref<1x1x8xf32, #tpu.memory_space<vmem>>, vector<1x1x8xf32>
    %8 = vector.shape_cast %7 : vector<1x1x8xf32> to vector<1x8xf32>
    %9 = vector.broadcast %8 : vector<1x8xf32> to vector<8x8xf32>
    %10 = arith.addf %6, %9 : vector<8x8xf32>
    %11 = tpu.iota {dimensions = array<i32: 0>} : vector<8x8xi32>
    %12 = tpu.iota {dimensions = array<i32: 1>} : vector<8x8xi32>
    %13 = arith.cmpi sgt, %12, %11 : vector<8x8xi32>
    %cst_14 = arith.constant -1.000000e+30 : f32
    %14 = vector.broadcast %cst_14 : f32 to vector<8x8xf32>
    %15 = arith.select %13, %14, %10 : vector<8x8xi1>, vector<8x8xf32>
    %cst_15 = arith.constant dense<0xFF800000> : vector<8xf32>
    %16 = vector.multi_reduction <maximumf>, %15, %cst_15 [1] : vector<8x8xf32> to vector<8xf32>
    %17 = vector.shape_cast %16 : vector<8xf32> to vector<8x1xf32>
    %18 = vector.broadcast %17 : vector<8x1xf32> to vector<8x8xf32>
    %19 = arith.subf %15, %18 : vector<8x8xf32>
    %20 = math.exp %19 : vector<8x8xf32>
    %cst_16 = arith.constant dense<0.000000e+00> : vector<8xf32>
    %21 = vector.multi_reduction <add>, %20, %cst_16 [1] : vector<8x8xf32> to vector<8xf32>
    %22 = vector.shape_cast %21 : vector<8xf32> to vector<8x1xf32>
    %23 = arith.truncf %20 : vector<8x8xf32> to vector<8x8xbf16>
    %cst_17 = arith.constant dense<0.000000e+00> : vector<8x8xf32>
    %24 = tpu.matmul %23, %5, %cst_17 {dimension_numbers = #tpu.dot_dimension_numbers<[1], [0], [0], [1], [0, 0, 1, 1], [], []>} : vector<8x8xbf16>, vector<8x8xbf16>, vector<8x8xf32> -> vector<8x8xf32>
    %25 = tpu.reciprocal %22 {approx = true} : vector<8x1xf32> -> vector<8x1xf32>
    %26 = vector.broadcast %25 : vector<8x1xf32> to vector<8x8xf32>
    %27 = arith.mulf %24, %26 : vector<8x8xf32>
    %28 = arith.truncf %27 : vector<8x8xf32> to vector<8x8xbf16>
    %c0_18 = arith.constant 0 : index
    %c0_19 = arith.constant 0 : index
    %c0_20 = arith.constant 0 : index
    %c0_21 = arith.constant 0 : index
    %29 = vector.load %arg6[%c0_18, %c0_19, %c0_20, %c0_21] : memref<1x1x8x8xbf16, #tpu.memory_space<vmem>>, vector<1x1x8x8xbf16>
    %30 = vector.shape_cast %29 : vector<1x1x8x8xbf16> to vector<8x8xbf16>
    %31 = vector.shape_cast %28 : vector<8x8xbf16> to vector<1x1x8x8xbf16>
    tpu.vector_store %arg6[%c0_18, %c0_19, %c0_20, %c0_21], %31 {strides = array<i32>} : memref<1x1x8x8xbf16, #tpu.memory_space<vmem>>, vector<1x1x8x8xbf16>,
    return
  }
  func.func @transform_0(%arg0: i32, %arg1: i32) -> (i32, i32, i32) {
    %c0_i32 = arith.constant 0 : i32
    %c0_i32_0 = arith.constant 0 : i32
    %c0_i32_1 = arith.constant 0 : i32
    return %arg0, %c0_i32, %c0_i32_0 : i32, i32, i32
  }
  func.func @transform_1(%arg0: i32, %arg1: i32) -> (i32, i32, i32, i32) {
    %c0_i32 = arith.constant 0 : i32
    %c0_i32_0 = arith.constant 0 : i32
    %c0_i32_1 = arith.constant 0 : i32
    return %arg0, %arg1, %c0_i32, %c0_i32_0 : i32, i32, i32, i32
  }
  func.func @transform_2(%arg0: i32, %arg1: i32) -> (i32, i32, i32, i32) {
    %c0_i32 = arith.constant 0 : i32
    %c0_i32_0 = arith.constant 0 : i32
    %c0_i32_1 = arith.constant 0 : i32
    return %arg0, %arg1, %c0_i32, %c0_i32_0 : i32, i32, i32, i32
  }
  func.func @transform_3(%arg0: i32, %arg1: i32) -> (i32, i32, i32, i32) {
    %c0_i32 = arith.constant 0 : i32
    %c0_i32_0 = arith.constant 0 : i32
    %c0_i32_1 = arith.constant 0 : i32
    return %arg0, %arg1, %c0_i32, %c0_i32_0 : i32, i32, i32, i32
  }
  func.func @transform_4(%arg0: i32, %arg1: i32) -> (i32, i32, i32, i32) {
    %c0_i32 = arith.constant 0 : i32
    %c0_i32_0 = arith.constant 0 : i32
    %c0_i32_1 = arith.constant 0 : i32
    return %arg0, %arg1, %c0_i32, %c0_i32_0 : i32, i32, i32, i32
  }
}

module attributes {stable_mosaic.version = 11 : i64} {
  func.func @_linear_kernel(%arg0: i32, %arg1: i32, %arg2: i32, %arg3: memref<16x32xbf16, #tpu.memory_space<vmem>>, %arg4: memref<32x96xbf16, #tpu.memory_space<vmem>>, %arg5: memref<1x32xf32, #tpu.memory_space<vmem>>, %arg6: memref<1x32xf32, #tpu.memory_space<vmem>>, %arg7: memref<1x96xf32, #tpu.memory_space<vmem>>, %arg8: memref<16x96xbf16, #tpu.memory_space<vmem>>, %arg9: memref<16x96xf32, #tpu.memory_space<vmem>>) attributes {dimension_semantics = [#tpu.dimension_semantics<parallel>, #tpu.dimension_semantics<parallel>, #tpu.dimension_semantics<arbitrary>], iteration_bounds = array<i64: 1, 1, 1>, scalar_prefetch = 0 : i64, scratch_operands = 1 : i64, tpu.core_type = #tpu.core_type<tc>, window_params = [{transform_indices = @transform_0, window_bounds = array<i64: 16, 32>}, {transform_indices = @transform_1, window_bounds = array<i64: 32, 96>}, {transform_indices = @transform_2, window_bounds = array<i64: 1, 32>}, {transform_indices = @transform_3, window_bounds = array<i64: 1, 32>}, {transform_indices = @transform_4, window_bounds = array<i64: 1, 96>}, {transform_indices = @transform_5, window_bounds = array<i64: 16, 96>}]} {
    %c0_i32 = arith.constant 0 : i32
    %0 = arith.cmpi eq, %arg2, %c0_i32 : i32
    %1 = arith.extui %0 : i1 to i32
    %c0_i32_0 = arith.constant 0 : i32
    %2 = arith.cmpi ne, %1, %c0_i32_0 : i32
    scf.if %2 {
      %cst_19 = arith.constant 0.000000e+00 : f32
      %36 = vector.broadcast %cst_19 : f32 to vector<16x96xf32>
      %c0_20 = arith.constant 0 : index
      %c0_21 = arith.constant 0 : index
      %37 = vector.load %arg9[%c0_20, %c0_21] : memref<16x96xf32, #tpu.memory_space<vmem>>, vector<16x96xf32>
      tpu.vector_store %arg9[%c0_20, %c0_21], %36 {strides = array<i32>} : memref<16x96xf32, #tpu.memory_space<vmem>>, vector<16x96xf32>,
    } else {
    }
    %c0 = arith.constant 0 : index
    %c0_1 = arith.constant 0 : index
    %3 = vector.load %arg3[%c0, %c0_1] : memref<16x32xbf16, #tpu.memory_space<vmem>>, vector<16x32xbf16>
    %4 = arith.extf %3 : vector<16x32xbf16> to vector<16x32xf32>
    %cst = arith.constant dense<0.000000e+00> : vector<16xf32>
    %5 = vector.multi_reduction <add>, %4, %cst [1] : vector<16x32xf32> to vector<16xf32>
    %6 = vector.shape_cast %5 : vector<16xf32> to vector<16x1xf32>
    %cst_2 = arith.constant 3.200000e+01 : f32
    %7 = vector.broadcast %cst_2 : f32 to vector<16x1xf32>
    %8 = arith.divf %6, %7 : vector<16x1xf32>
    %9 = vector.broadcast %8 : vector<16x1xf32> to vector<16x32xf32>
    %10 = arith.subf %4, %9 : vector<16x32xf32>
    %11 = arith.mulf %10, %10 : vector<16x32xf32>
    %cst_3 = arith.constant dense<0.000000e+00> : vector<16xf32>
    %12 = vector.multi_reduction <add>, %11, %cst_3 [1] : vector<16x32xf32> to vector<16xf32>
    %13 = vector.shape_cast %12 : vector<16xf32> to vector<16x1xf32>
    %cst_4 = arith.constant 3.200000e+01 : f32
    %14 = vector.broadcast %cst_4 : f32 to vector<16x1xf32>
    %15 = arith.divf %13, %14 : vector<16x1xf32>
    %cst_5 = arith.constant 9.99999974E-6 : f32
    %16 = vector.broadcast %cst_5 : f32 to vector<16x1xf32>
    %17 = arith.addf %15, %16 : vector<16x1xf32>
    %18 = math.rsqrt %17 : vector<16x1xf32>
    %19 = vector.broadcast %18 : vector<16x1xf32> to vector<16x32xf32>
    %20 = arith.mulf %10, %19 : vector<16x32xf32>
    %c0_6 = arith.constant 0 : index
    %c0_7 = arith.constant 0 : index
    %21 = vector.load %arg5[%c0_6, %c0_7] : memref<1x32xf32, #tpu.memory_space<vmem>>, vector<1x32xf32>
    %22 = vector.broadcast %21 : vector<1x32xf32> to vector<16x32xf32>
    %23 = arith.mulf %20, %22 : vector<16x32xf32>
    %c0_8 = arith.constant 0 : index
    %c0_9 = arith.constant 0 : index
    %24 = vector.load %arg6[%c0_8, %c0_9] : memref<1x32xf32, #tpu.memory_space<vmem>>, vector<1x32xf32>
    %25 = vector.broadcast %24 : vector<1x32xf32> to vector<16x32xf32>
    %26 = arith.addf %23, %25 : vector<16x32xf32>
    %27 = arith.truncf %26 : vector<16x32xf32> to vector<16x32xbf16>
    %c0_10 = arith.constant 0 : index
    %c0_11 = arith.constant 0 : index
    %28 = vector.load %arg9[%c0_10, %c0_11] : memref<16x96xf32, #tpu.memory_space<vmem>>, vector<16x96xf32>
    %c0_12 = arith.constant 0 : index
    %c0_13 = arith.constant 0 : index
    %29 = vector.load %arg4[%c0_12, %c0_13] : memref<32x96xbf16, #tpu.memory_space<vmem>>, vector<32x96xbf16>
    %cst_14 = arith.constant dense<0.000000e+00> : vector<16x96xf32>
    %30 = tpu.matmul %27, %29, %cst_14 {dimension_numbers = #tpu.dot_dimension_numbers<[1], [0], [0], [1], [0, 0, 1, 1], [], []>} : vector<16x32xbf16>, vector<32x96xbf16>, vector<16x96xf32> -> vector<16x96xf32>
    %31 = arith.addf %28, %30 : vector<16x96xf32>
    %c0_15 = arith.constant 0 : index
    %c0_16 = arith.constant 0 : index
    %32 = vector.load %arg9[%c0_15, %c0_16] : memref<16x96xf32, #tpu.memory_space<vmem>>, vector<16x96xf32>
    tpu.vector_store %arg9[%c0_15, %c0_16], %31 {strides = array<i32>} : memref<16x96xf32, #tpu.memory_space<vmem>>, vector<16x96xf32>,
    %c0_i32_17 = arith.constant 0 : i32
    %33 = arith.cmpi eq, %arg2, %c0_i32_17 : i32
    %34 = arith.extui %33 : i1 to i32
    %c0_i32_18 = arith.constant 0 : i32
    %35 = arith.cmpi ne, %34, %c0_i32_18 : i32
    scf.if %35 {
      %c0_19 = arith.constant 0 : index
      %c0_20 = arith.constant 0 : index
      %36 = vector.load %arg9[%c0_19, %c0_20] : memref<16x96xf32, #tpu.memory_space<vmem>>, vector<16x96xf32>
      %c0_21 = arith.constant 0 : index
      %c0_22 = arith.constant 0 : index
      %37 = vector.load %arg7[%c0_21, %c0_22] : memref<1x96xf32, #tpu.memory_space<vmem>>, vector<1x96xf32>
      %38 = vector.broadcast %37 : vector<1x96xf32> to vector<16x96xf32>
      %39 = arith.addf %36, %38 : vector<16x96xf32>
      %40 = arith.truncf %39 : vector<16x96xf32> to vector<16x96xbf16>
      %c0_23 = arith.constant 0 : index
      %c0_24 = arith.constant 0 : index
      %41 = vector.load %arg8[%c0_23, %c0_24] : memref<16x96xbf16, #tpu.memory_space<vmem>>, vector<16x96xbf16>
      tpu.vector_store %arg8[%c0_23, %c0_24], %40 {strides = array<i32>} : memref<16x96xbf16, #tpu.memory_space<vmem>>, vector<16x96xbf16>,
    } else {
    }
    return
  }
  func.func @transform_0(%arg0: i32, %arg1: i32, %arg2: i32) -> (i32, i32) {
    %c0_i32 = arith.constant 0 : i32
    return %arg0, %arg2 : i32, i32
  }
  func.func @transform_1(%arg0: i32, %arg1: i32, %arg2: i32) -> (i32, i32) {
    %c0_i32 = arith.constant 0 : i32
    return %arg2, %arg1 : i32, i32
  }
  func.func @transform_2(%arg0: i32, %arg1: i32, %arg2: i32) -> (i32, i32) {
    %c0_i32 = arith.constant 0 : i32
    %c0_i32_0 = arith.constant 0 : i32
    return %c0_i32, %arg2 : i32, i32
  }
  func.func @transform_3(%arg0: i32, %arg1: i32, %arg2: i32) -> (i32, i32) {
    %c0_i32 = arith.constant 0 : i32
    %c0_i32_0 = arith.constant 0 : i32
    return %c0_i32, %arg2 : i32, i32
  }
  func.func @transform_4(%arg0: i32, %arg1: i32, %arg2: i32) -> (i32, i32) {
    %c0_i32 = arith.constant 0 : i32
    %c0_i32_0 = arith.constant 0 : i32
    return %c0_i32, %arg1 : i32, i32
  }
  func.func @transform_5(%arg0: i32, %arg1: i32, %arg2: i32) -> (i32, i32) {
    %c0_i32 = arith.constant 0 : i32
    return %arg0, %arg1 : i32, i32
  }
}

module attributes {stable_mosaic.version = 11 : i64} {
  func.func @_linear_kernel(%arg0: i32, %arg1: i32, %arg2: i32, %arg3: memref<16x32xbf16, #tpu.memory_space<vmem>>, %arg4: memref<32x32xbf16, #tpu.memory_space<vmem>>, %arg5: memref<1x32xf32, #tpu.memory_space<vmem>>, %arg6: memref<16x32xbf16, #tpu.memory_space<vmem>>, %arg7: memref<16x32xbf16, #tpu.memory_space<vmem>>, %arg8: memref<16x32xf32, #tpu.memory_space<vmem>>) attributes {dimension_semantics = [#tpu.dimension_semantics<parallel>, #tpu.dimension_semantics<parallel>, #tpu.dimension_semantics<arbitrary>], iteration_bounds = array<i64: 1, 1, 1>, scalar_prefetch = 0 : i64, scratch_operands = 1 : i64, tpu.core_type = #tpu.core_type<tc>, window_params = [{transform_indices = @transform_0, window_bounds = array<i64: 16, 32>}, {transform_indices = @transform_1, window_bounds = array<i64: 32, 32>}, {transform_indices = @transform_2, window_bounds = array<i64: 1, 32>}, {transform_indices = @transform_3, window_bounds = array<i64: 16, 32>}, {transform_indices = @transform_4, window_bounds = array<i64: 16, 32>}]} {
    %c0_i32 = arith.constant 0 : i32
    %0 = arith.cmpi eq, %arg2, %c0_i32 : i32
    %1 = arith.extui %0 : i1 to i32
    %c0_i32_0 = arith.constant 0 : i32
    %2 = arith.cmpi ne, %1, %c0_i32_0 : i32
    scf.if %2 {
      %cst_10 = arith.constant 0.000000e+00 : f32
      %12 = vector.broadcast %cst_10 : f32 to vector<16x32xf32>
      %c0_11 = arith.constant 0 : index
      %c0_12 = arith.constant 0 : index
      %13 = vector.load %arg8[%c0_11, %c0_12] : memref<16x32xf32, #tpu.memory_space<vmem>>, vector<16x32xf32>
      tpu.vector_store %arg8[%c0_11, %c0_12], %12 {strides = array<i32>} : memref<16x32xf32, #tpu.memory_space<vmem>>, vector<16x32xf32>,
    } else {
    }
    %c0 = arith.constant 0 : index
    %c0_1 = arith.constant 0 : index
    %3 = vector.load %arg3[%c0, %c0_1] : memref<16x32xbf16, #tpu.memory_space<vmem>>, vector<16x32xbf16>
    %c0_2 = arith.constant 0 : index
    %c0_3 = arith.constant 0 : index
    %4 = vector.load %arg8[%c0_2, %c0_3] : memref<16x32xf32, #tpu.memory_space<vmem>>, vector<16x32xf32>
    %c0_4 = arith.constant 0 : index
    %c0_5 = arith.constant 0 : index
    %5 = vector.load %arg4[%c0_4, %c0_5] : memref<32x32xbf16, #tpu.memory_space<vmem>>, vector<32x32xbf16>
    %cst = arith.constant dense<0.000000e+00> : vector<16x32xf32>
    %6 = tpu.matmul %3, %5, %cst {dimension_numbers = #tpu.dot_dimension_numbers<[1], [0], [0], [1], [0, 0, 1, 1], [], []>} : vector<16x32xbf16>, vector<32x32xbf16>, vector<16x32xf32> -> vector<16x32xf32>
    %7 = arith.addf %4, %6 : vector<16x32xf32>
    %c0_6 = arith.constant 0 : index
    %c0_7 = arith.constant 0 : index
    %8 = vector.load %arg8[%c0_6, %c0_7] : memref<16x32xf32, #tpu.memory_space<vmem>>, vector<16x32xf32>
    tpu.vector_store %arg8[%c0_6, %c0_7], %7 {strides = array<i32>} : memref<16x32xf32, #tpu.memory_space<vmem>>, vector<16x32xf32>,
    %c0_i32_8 = arith.constant 0 : i32
    %9 = arith.cmpi eq, %arg2, %c0_i32_8 : i32
    %10 = arith.extui %9 : i1 to i32
    %c0_i32_9 = arith.constant 0 : i32
    %11 = arith.cmpi ne, %10, %c0_i32_9 : i32
    scf.if %11 {
      %c0_10 = arith.constant 0 : index
      %c0_11 = arith.constant 0 : index
      %12 = vector.load %arg8[%c0_10, %c0_11] : memref<16x32xf32, #tpu.memory_space<vmem>>, vector<16x32xf32>
      %c0_12 = arith.constant 0 : index
      %c0_13 = arith.constant 0 : index
      %13 = vector.load %arg5[%c0_12, %c0_13] : memref<1x32xf32, #tpu.memory_space<vmem>>, vector<1x32xf32>
      %14 = vector.broadcast %13 : vector<1x32xf32> to vector<16x32xf32>
      %15 = arith.addf %12, %14 : vector<16x32xf32>
      %c0_14 = arith.constant 0 : index
      %c0_15 = arith.constant 0 : index
      %16 = vector.load %arg6[%c0_14, %c0_15] : memref<16x32xbf16, #tpu.memory_space<vmem>>, vector<16x32xbf16>
      %17 = arith.extf %16 : vector<16x32xbf16> to vector<16x32xf32>
      %18 = arith.addf %15, %17 : vector<16x32xf32>
      %19 = arith.truncf %18 : vector<16x32xf32> to vector<16x32xbf16>
      %c0_16 = arith.constant 0 : index
      %c0_17 = arith.constant 0 : index
      %20 = vector.load %arg7[%c0_16, %c0_17] : memref<16x32xbf16, #tpu.memory_space<vmem>>, vector<16x32xbf16>
      tpu.vector_store %arg7[%c0_16, %c0_17], %19 {strides = array<i32>} : memref<16x32xbf16, #tpu.memory_space<vmem>>, vector<16x32xbf16>,
    } else {
    }
    return
  }
  func.func @transform_0(%arg0: i32, %arg1: i32, %arg2: i32) -> (i32, i32) {
    %c0_i32 = arith.constant 0 : i32
    return %arg0, %arg2 : i32, i32
  }
  func.func @transform_1(%arg0: i32, %arg1: i32, %arg2: i32) -> (i32, i32) {
    %c0_i32 = arith.constant 0 : i32
    return %arg2, %arg1 : i32, i32
  }
  func.func @transform_2(%arg0: i32, %arg1: i32, %arg2: i32) -> (i32, i32) {
    %c0_i32 = arith.constant 0 : i32
    %c0_i32_0 = arith.constant 0 : i32
    return %c0_i32, %arg1 : i32, i32
  }
  func.func @transform_3(%arg0: i32, %arg1: i32, %arg2: i32) -> (i32, i32) {
    %c0_i32 = arith.constant 0 : i32
    return %arg0, %arg1 : i32, i32
  }
  func.func @transform_4(%arg0: i32, %arg1: i32, %arg2: i32) -> (i32, i32) {
    %c0_i32 = arith.constant 0 : i32
    return %arg0, %arg1 : i32, i32
  }
}

module attributes {stable_mosaic.version = 11 : i64} {
  func.func @_linear_kernel(%arg0: i32, %arg1: i32, %arg2: i32, %arg3: memref<16x32xbf16, #tpu.memory_space<vmem>>, %arg4: memref<32x32xbf16, #tpu.memory_space<vmem>>, %arg5: memref<1x32xf32, #tpu.memory_space<vmem>>, %arg6: memref<1x32xf32, #tpu.memory_space<vmem>>, %arg7: memref<1x32xf32, #tpu.memory_space<vmem>>, %arg8: memref<16x32xbf16, #tpu.memory_space<vmem>>, %arg9: memref<16x32xf32, #tpu.memory_space<vmem>>) attributes {dimension_semantics = [#tpu.dimension_semantics<parallel>, #tpu.dimension_semantics<parallel>, #tpu.dimension_semantics<arbitrary>], iteration_bounds = array<i64: 1, 1, 1>, scalar_prefetch = 0 : i64, scratch_operands = 1 : i64, tpu.core_type = #tpu.core_type<tc>, window_params = [{transform_indices = @transform_0, window_bounds = array<i64: 16, 32>}, {transform_indices = @transform_1, window_bounds = array<i64: 32, 32>}, {transform_indices = @transform_2, window_bounds = array<i64: 1, 32>}, {transform_indices = @transform_3, window_bounds = array<i64: 1, 32>}, {transform_indices = @transform_4, window_bounds = array<i64: 1, 32>}, {transform_indices = @transform_5, window_bounds = array<i64: 16, 32>}]} {
    %c0_i32 = arith.constant 0 : i32
    %0 = arith.cmpi eq, %arg2, %c0_i32 : i32
    %1 = arith.extui %0 : i1 to i32
    %c0_i32_0 = arith.constant 0 : i32
    %2 = arith.cmpi ne, %1, %c0_i32_0 : i32
    scf.if %2 {
      %cst_19 = arith.constant 0.000000e+00 : f32
      %36 = vector.broadcast %cst_19 : f32 to vector<16x32xf32>
      %c0_20 = arith.constant 0 : index
      %c0_21 = arith.constant 0 : index
      %37 = vector.load %arg9[%c0_20, %c0_21] : memref<16x32xf32, #tpu.memory_space<vmem>>, vector<16x32xf32>
      tpu.vector_store %arg9[%c0_20, %c0_21], %36 {strides = array<i32>} : memref<16x32xf32, #tpu.memory_space<vmem>>, vector<16x32xf32>,
    } else {
    }
    %c0 = arith.constant 0 : index
    %c0_1 = arith.constant 0 : index
    %3 = vector.load %arg3[%c0, %c0_1] : memref<16x32xbf16, #tpu.memory_space<vmem>>, vector<16x32xbf16>
    %4 = arith.extf %3 : vector<16x32xbf16> to vector<16x32xf32>
    %cst = arith.constant dense<0.000000e+00> : vector<16xf32>
    %5 = vector.multi_reduction <add>, %4, %cst [1] : vector<16x32xf32> to vector<16xf32>
    %6 = vector.shape_cast %5 : vector<16xf32> to vector<16x1xf32>
    %cst_2 = arith.constant 3.200000e+01 : f32
    %7 = vector.broadcast %cst_2 : f32 to vector<16x1xf32>
    %8 = arith.divf %6, %7 : vector<16x1xf32>
    %9 = vector.broadcast %8 : vector<16x1xf32> to vector<16x32xf32>
    %10 = arith.subf %4, %9 : vector<16x32xf32>
    %11 = arith.mulf %10, %10 : vector<16x32xf32>
    %cst_3 = arith.constant dense<0.000000e+00> : vector<16xf32>
    %12 = vector.multi_reduction <add>, %11, %cst_3 [1] : vector<16x32xf32> to vector<16xf32>
    %13 = vector.shape_cast %12 : vector<16xf32> to vector<16x1xf32>
    %cst_4 = arith.constant 3.200000e+01 : f32
    %14 = vector.broadcast %cst_4 : f32 to vector<16x1xf32>
    %15 = arith.divf %13, %14 : vector<16x1xf32>
    %cst_5 = arith.constant 9.99999974E-6 : f32
    %16 = vector.broadcast %cst_5 : f32 to vector<16x1xf32>
    %17 = arith.addf %15, %16 : vector<16x1xf32>
    %18 = math.rsqrt %17 : vector<16x1xf32>
    %19 = vector.broadcast %18 : vector<16x1xf32> to vector<16x32xf32>
    %20 = arith.mulf %10, %19 : vector<16x32xf32>
    %c0_6 = arith.constant 0 : index
    %c0_7 = arith.constant 0 : index
    %21 = vector.load %arg5[%c0_6, %c0_7] : memref<1x32xf32, #tpu.memory_space<vmem>>, vector<1x32xf32>
    %22 = vector.broadcast %21 : vector<1x32xf32> to vector<16x32xf32>
    %23 = arith.mulf %20, %22 : vector<16x32xf32>
    %c0_8 = arith.constant 0 : index
    %c0_9 = arith.constant 0 : index
    %24 = vector.load %arg6[%c0_8, %c0_9] : memref<1x32xf32, #tpu.memory_space<vmem>>, vector<1x32xf32>
    %25 = vector.broadcast %24 : vector<1x32xf32> to vector<16x32xf32>
    %26 = arith.addf %23, %25 : vector<16x32xf32>
    %27 = arith.truncf %26 : vector<16x32xf32> to vector<16x32xbf16>
    %c0_10 = arith.constant 0 : index
    %c0_11 = arith.constant 0 : index
    %28 = vector.load %arg9[%c0_10, %c0_11] : memref<16x32xf32, #tpu.memory_space<vmem>>, vector<16x32xf32>
    %c0_12 = arith.constant 0 : index
    %c0_13 = arith.constant 0 : index
    %29 = vector.load %arg4[%c0_12, %c0_13] : memref<32x32xbf16, #tpu.memory_space<vmem>>, vector<32x32xbf16>
    %cst_14 = arith.constant dense<0.000000e+00> : vector<16x32xf32>
    %30 = tpu.matmul %27, %29, %cst_14 {dimension_numbers = #tpu.dot_dimension_numbers<[1], [0], [0], [1], [0, 0, 1, 1], [], []>} : vector<16x32xbf16>, vector<32x32xbf16>, vector<16x32xf32> -> vector<16x32xf32>
    %31 = arith.addf %28, %30 : vector<16x32xf32>
    %c0_15 = arith.constant 0 : index
    %c0_16 = arith.constant 0 : index
    %32 = vector.load %arg9[%c0_15, %c0_16] : memref<16x32xf32, #tpu.memory_space<vmem>>, vector<16x32xf32>
    tpu.vector_store %arg9[%c0_15, %c0_16], %31 {strides = array<i32>} : memref<16x32xf32, #tpu.memory_space<vmem>>, vector<16x32xf32>,
    %c0_i32_17 = arith.constant 0 : i32
    %33 = arith.cmpi eq, %arg2, %c0_i32_17 : i32
    %34 = arith.extui %33 : i1 to i32
    %c0_i32_18 = arith.constant 0 : i32
    %35 = arith.cmpi ne, %34, %c0_i32_18 : i32
    scf.if %35 {
      %c0_19 = arith.constant 0 : index
      %c0_20 = arith.constant 0 : index
      %36 = vector.load %arg9[%c0_19, %c0_20] : memref<16x32xf32, #tpu.memory_space<vmem>>, vector<16x32xf32>
      %c0_21 = arith.constant 0 : index
      %c0_22 = arith.constant 0 : index
      %37 = vector.load %arg7[%c0_21, %c0_22] : memref<1x32xf32, #tpu.memory_space<vmem>>, vector<1x32xf32>
      %38 = vector.broadcast %37 : vector<1x32xf32> to vector<16x32xf32>
      %39 = arith.addf %36, %38 : vector<16x32xf32>
      %40 = arith.truncf %39 : vector<16x32xf32> to vector<16x32xbf16>
      %c0_23 = arith.constant 0 : index
      %c0_24 = arith.constant 0 : index
      %41 = vector.load %arg8[%c0_23, %c0_24] : memref<16x32xbf16, #tpu.memory_space<vmem>>, vector<16x32xbf16>
      tpu.vector_store %arg8[%c0_23, %c0_24], %40 {strides = array<i32>} : memref<16x32xbf16, #tpu.memory_space<vmem>>, vector<16x32xbf16>,
    } else {
    }
    return
  }
  func.func @transform_0(%arg0: i32, %arg1: i32, %arg2: i32) -> (i32, i32) {
    %c0_i32 = arith.constant 0 : i32
    return %arg0, %arg2 : i32, i32
  }
  func.func @transform_1(%arg0: i32, %arg1: i32, %arg2: i32) -> (i32, i32) {
    %c0_i32 = arith.constant 0 : i32
    return %arg2, %arg1 : i32, i32
  }
  func.func @transform_2(%arg0: i32, %arg1: i32, %arg2: i32) -> (i32, i32) {
    %c0_i32 = arith.constant 0 : i32
    %c0_i32_0 = arith.constant 0 : i32
    return %c0_i32, %arg2 : i32, i32
  }
  func.func @transform_3(%arg0: i32, %arg1: i32, %arg2: i32) -> (i32, i32) {
    %c0_i32 = arith.constant 0 : i32
    %c0_i32_0 = arith.constant 0 : i32
    return %c0_i32, %arg2 : i32, i32
  }
  func.func @transform_4(%arg0: i32, %arg1: i32, %arg2: i32) -> (i32, i32) {
    %c0_i32 = arith.constant 0 : i32
    %c0_i32_0 = arith.constant 0 : i32
    return %c0_i32, %arg1 : i32, i32
  }
  func.func @transform_5(%arg0: i32, %arg1: i32, %arg2: i32) -> (i32, i32) {
    %c0_i32 = arith.constant 0 : i32
    return %arg0, %arg1 : i32, i32
  }
}

module attributes {stable_mosaic.version = 11 : i64} {
  func.func @_linear_kernel(%arg0: i32, %arg1: i32, %arg2: i32, %arg3: memref<32x32xbf16, #tpu.memory_space<vmem>>, %arg4: memref<32x64xbf16, #tpu.memory_space<vmem>>, %arg5: memref<1x64xf32, #tpu.memory_space<vmem>>, %arg6: memref<32x64xbf16, #tpu.memory_space<vmem>>, %arg7: memref<32x64xf32, #tpu.memory_space<vmem>>) attributes {dimension_semantics = [#tpu.dimension_semantics<parallel>, #tpu.dimension_semantics<parallel>, #tpu.dimension_semantics<arbitrary>], iteration_bounds = array<i64: 1, 1, 1>, scalar_prefetch = 0 : i64, scratch_operands = 1 : i64, tpu.core_type = #tpu.core_type<tc>, window_params = [{transform_indices = @transform_0, window_bounds = array<i64: 32, 32>}, {transform_indices = @transform_1, window_bounds = array<i64: 32, 64>}, {transform_indices = @transform_2, window_bounds = array<i64: 1, 64>}, {transform_indices = @transform_3, window_bounds = array<i64: 32, 64>}]} {
    %c0_i32 = arith.constant 0 : i32
    %0 = arith.cmpi eq, %arg2, %c0_i32 : i32
    %1 = arith.extui %0 : i1 to i32
    %c0_i32_0 = arith.constant 0 : i32
    %2 = arith.cmpi ne, %1, %c0_i32_0 : i32
    scf.if %2 {
      %cst_10 = arith.constant 0.000000e+00 : f32
      %12 = vector.broadcast %cst_10 : f32 to vector<32x64xf32>
      %c0_11 = arith.constant 0 : index
      %c0_12 = arith.constant 0 : index
      %13 = vector.load %arg7[%c0_11, %c0_12] : memref<32x64xf32, #tpu.memory_space<vmem>>, vector<32x64xf32>
      tpu.vector_store %arg7[%c0_11, %c0_12], %12 {strides = array<i32>} : memref<32x64xf32, #tpu.memory_space<vmem>>, vector<32x64xf32>,
    } else {
    }
    %c0 = arith.constant 0 : index
    %c0_1 = arith.constant 0 : index
    %3 = vector.load %arg3[%c0, %c0_1] : memref<32x32xbf16, #tpu.memory_space<vmem>>, vector<32x32xbf16>
    %c0_2 = arith.constant 0 : index
    %c0_3 = arith.constant 0 : index
    %4 = vector.load %arg7[%c0_2, %c0_3] : memref<32x64xf32, #tpu.memory_space<vmem>>, vector<32x64xf32>
    %c0_4 = arith.constant 0 : index
    %c0_5 = arith.constant 0 : index
    %5 = vector.load %arg4[%c0_4, %c0_5] : memref<32x64xbf16, #tpu.memory_space<vmem>>, vector<32x64xbf16>
    %cst = arith.constant dense<0.000000e+00> : vector<32x64xf32>
    %6 = tpu.matmul %3, %5, %cst {dimension_numbers = #tpu.dot_dimension_numbers<[1], [0], [0], [1], [0, 0, 1, 1], [], []>} : vector<32x32xbf16>, vector<32x64xbf16>, vector<32x64xf32> -> vector<32x64xf32>
    %7 = arith.addf %4, %6 : vector<32x64xf32>
    %c0_6 = arith.constant 0 : index
    %c0_7 = arith.constant 0 : index
    %8 = vector.load %arg7[%c0_6, %c0_7] : memref<32x64xf32, #tpu.memory_space<vmem>>, vector<32x64xf32>
    tpu.vector_store %arg7[%c0_6, %c0_7], %7 {strides = array<i32>} : memref<32x64xf32, #tpu.memory_space<vmem>>, vector<32x64xf32>,
    %c0_i32_8 = arith.constant 0 : i32
    %9 = arith.cmpi eq, %arg2, %c0_i32_8 : i32
    %10 = arith.extui %9 : i1 to i32
    %c0_i32_9 = arith.constant 0 : i32
    %11 = arith.cmpi ne, %10, %c0_i32_9 : i32
    scf.if %11 {
      %c0_10 = arith.constant 0 : index
      %c0_11 = arith.constant 0 : index
      %12 = vector.load %arg7[%c0_10, %c0_11] : memref<32x64xf32, #tpu.memory_space<vmem>>, vector<32x64xf32>
      %c0_12 = arith.constant 0 : index
      %c0_13 = arith.constant 0 : index
      %13 = vector.load %arg5[%c0_12, %c0_13] : memref<1x64xf32, #tpu.memory_space<vmem>>, vector<1x64xf32>
      %14 = vector.broadcast %13 : vector<1x64xf32> to vector<32x64xf32>
      %15 = arith.addf %12, %14 : vector<32x64xf32>
      %16 = arith.truncf %15 : vector<32x64xf32> to vector<32x64xbf16>
      %c0_14 = arith.constant 0 : index
      %c0_15 = arith.constant 0 : index
      %17 = vector.load %arg6[%c0_14, %c0_15] : memref<32x64xbf16, #tpu.memory_space<vmem>>, vector<32x64xbf16>
      tpu.vector_store %arg6[%c0_14, %c0_15], %16 {strides = array<i32>} : memref<32x64xbf16, #tpu.memory_space<vmem>>, vector<32x64xbf16>,
    } else {
    }
    return
  }
  func.func @transform_0(%arg0: i32, %arg1: i32, %arg2: i32) -> (i32, i32) {
    %c0_i32 = arith.constant 0 : i32
    return %arg0, %arg2 : i32, i32
  }
  func.func @transform_1(%arg0: i32, %arg1: i32, %arg2: i32) -> (i32, i32) {
    %c0_i32 = arith.constant 0 : i32
    return %arg2, %arg1 : i32, i32
  }
  func.func @transform_2(%arg0: i32, %arg1: i32, %arg2: i32) -> (i32, i32) {
    %c0_i32 = arith.constant 0 : i32
    %c0_i32_0 = arith.constant 0 : i32
    return %c0_i32, %arg1 : i32, i32
  }
  func.func @transform_3(%arg0: i32, %arg1: i32, %arg2: i32) -> (i32, i32) {
    %c0_i32 = arith.constant 0 : i32
    return %arg0, %arg1 : i32, i32
  }
}

module attributes {stable_mosaic.version = 11 : i64} {
  func.func @_attention_kernel(%arg0: i32, %arg1: i32, %arg2: memref<1x1x16xf32, #tpu.memory_space<vmem>>, %arg3: memref<1x1x8x8xbf16, #tpu.memory_space<vmem>>, %arg4: memref<1x1x16x8xbf16, #tpu.memory_space<vmem>>, %arg5: memref<1x1x16x8xbf16, #tpu.memory_space<vmem>>, %arg6: memref<1x1x8x8xbf16, #tpu.memory_space<vmem>>) attributes {dimension_semantics = [#tpu.dimension_semantics<parallel>, #tpu.dimension_semantics<parallel>], iteration_bounds = array<i64: 2, 4>, scalar_prefetch = 0 : i64, scratch_operands = 0 : i64, tpu.core_type = #tpu.core_type<tc>, window_params = [{transform_indices = @transform_0, window_bounds = array<i64: 1, 1, 16>}, {transform_indices = @transform_1, window_bounds = array<i64: 1, 1, 8, 8>}, {transform_indices = @transform_2, window_bounds = array<i64: 1, 1, 16, 8>}, {transform_indices = @transform_3, window_bounds = array<i64: 1, 1, 16, 8>}, {transform_indices = @transform_4, window_bounds = array<i64: 1, 1, 8, 8>}]} {
    %c0 = arith.constant 0 : index
    %c0_0 = arith.constant 0 : index
    %c0_1 = arith.constant 0 : index
    %c0_2 = arith.constant 0 : index
    %0 = vector.load %arg3[%c0, %c0_0, %c0_1, %c0_2] : memref<1x1x8x8xbf16, #tpu.memory_space<vmem>>, vector<1x1x8x8xbf16>
    %1 = vector.shape_cast %0 : vector<1x1x8x8xbf16> to vector<8x8xbf16>
    %c0_3 = arith.constant 0 : index
    %c0_4 = arith.constant 0 : index
    %c0_5 = arith.constant 0 : index
    %c0_6 = arith.constant 0 : index
    %2 = vector.load %arg4[%c0_3, %c0_4, %c0_5, %c0_6] : memref<1x1x16x8xbf16, #tpu.memory_space<vmem>>, vector<1x1x16x8xbf16>
    %3 = vector.shape_cast %2 : vector<1x1x16x8xbf16> to vector<16x8xbf16>
    %c0_7 = arith.constant 0 : index
    %c0_8 = arith.constant 0 : index
    %c0_9 = arith.constant 0 : index
    %c0_10 = arith.constant 0 : index
    %4 = vector.load %arg5[%c0_7, %c0_8, %c0_9, %c0_10] : memref<1x1x16x8xbf16, #tpu.memory_space<vmem>>, vector<1x1x16x8xbf16>
    %5 = vector.shape_cast %4 : vector<1x1x16x8xbf16> to vector<16x8xbf16>
    %cst = arith.constant dense<0.000000e+00> : vector<8x16xf32>
    %6 = tpu.matmul %1, %3, %cst {dimension_numbers = #tpu.dot_dimension_numbers<[1], [1], [0], [0], [0, 0, 1, 0], [], []>} : vector<8x8xbf16>, vector<16x8xbf16>, vector<8x16xf32> -> vector<8x16xf32>
    %c0_11 = arith.constant 0 : index
    %c0_12 = arith.constant 0 : index
    %c0_13 = arith.constant 0 : index
    %7 = vector.load %arg2[%c0_11, %c0_12, %c0_13] : memref<1x1x16xf32, #tpu.memory_space<vmem>>, vector<1x1x16xf32>
    %8 = vector.shape_cast %7 : vector<1x1x16xf32> to vector<1x16xf32>
    %9 = vector.broadcast %8 : vector<1x16xf32> to vector<8x16xf32>
    %10 = arith.addf %6, %9 : vector<8x16xf32>
    %cst_14 = arith.constant dense<0xFF800000> : vector<8xf32>
    %11 = vector.multi_reduction <maximumf>, %10, %cst_14 [1] : vector<8x16xf32> to vector<8xf32>
    %12 = vector.shape_cast %11 : vector<8xf32> to vector<8x1xf32>
    %13 = vector.broadcast %12 : vector<8x1xf32> to vector<8x16xf32>
    %14 = arith.subf %10, %13 : vector<8x16xf32>
    %15 = math.exp %14 : vector<8x16xf32>
    %cst_15 = arith.constant dense<0.000000e+00> : vector<8xf32>
    %16 = vector.multi_reduction <add>, %15, %cst_15 [1] : vector<8x16xf32> to vector<8xf32>
    %17 = vector.shape_cast %16 : vector<8xf32> to vector<8x1xf32>
    %18 = arith.truncf %15 : vector<8x16xf32> to vector<8x16xbf16>
    %cst_16 = arith.constant dense<0.000000e+00> : vector<8x8xf32>
    %19 = tpu.matmul %18, %5, %cst_16 {dimension_numbers = #tpu.dot_dimension_numbers<[1], [0], [0], [1], [0, 0, 1, 1], [], []>} : vector<8x16xbf16>, vector<16x8xbf16>, vector<8x8xf32> -> vector<8x8xf32>
    %20 = tpu.reciprocal %17 {approx = true} : vector<8x1xf32> -> vector<8x1xf32>
    %21 = vector.broadcast %20 : vector<8x1xf32> to vector<8x8xf32>
    %22 = arith.mulf %19, %21 : vector<8x8xf32>
    %23 = arith.truncf %22 : vector<8x8xf32> to vector<8x8xbf16>
    %c0_17 = arith.constant 0 : index
    %c0_18 = arith.constant 0 : index
    %c0_19 = arith.constant 0 : index
    %c0_20 = arith.constant 0 : index
    %24 = vector.load %arg6[%c0_17, %c0_18, %c0_19, %c0_20] : memref<1x1x8x8xbf16, #tpu.memory_space<vmem>>, vector<1x1x8x8xbf16>
    %25 = vector.shape_cast %24 : vector<1x1x8x8xbf16> to vector<8x8xbf16>
    %26 = vector.shape_cast %23 : vector<8x8xbf16> to vector<1x1x8x8xbf16>
    tpu.vector_store %arg6[%c0_17, %c0_18, %c0_19, %c0_20], %26 {strides = array<i32>} : memref<1x1x8x8xbf16, #tpu.memory_space<vmem>>, vector<1x1x8x8xbf16>,
    return
  }
  func.func @transform_0(%arg0: i32, %arg1: i32) -> (i32, i32, i32) {
    %c0_i32 = arith.constant 0 : i32
    %c0_i32_0 = arith.constant 0 : i32
    %c0_i32_1 = arith.constant 0 : i32
    return %arg0, %c0_i32, %c0_i32_0 : i32, i32, i32
  }
  func.func @transform_1(%arg0: i32, %arg1: i32) -> (i32, i32, i32, i32) {
    %c0_i32 = arith.constant 0 : i32
    %c0_i32_0 = arith.constant 0 : i32
    %c0_i32_1 = arith.constant 0 : i32
    return %arg0, %arg1, %c0_i32, %c0_i32_0 : i32, i32, i32, i32
  }
  func.func @transform_2(%arg0: i32, %arg1: i32) -> (i32, i32, i32, i32) {
    %c0_i32 = arith.constant 0 : i32
    %c0_i32_0 = arith.constant 0 : i32
    %c0_i32_1 = arith.constant 0 : i32
    return %arg0, %arg1, %c0_i32, %c0_i32_0 : i32, i32, i32, i32
  }
  func.func @transform_3(%arg0: i32, %arg1: i32) -> (i32, i32, i32, i32) {
    %c0_i32 = arith.constant 0 : i32
    %c0_i32_0 = arith.constant 0 : i32
    %c0_i32_1 = arith.constant 0 : i32
    return %arg0, %arg1, %c0_i32, %c0_i32_0 : i32, i32, i32, i32
  }
  func.func @transform_4(%arg0: i32, %arg1: i32) -> (i32, i32, i32, i32) {
    %c0_i32 = arith.constant 0 : i32
    %c0_i32_0 = arith.constant 0 : i32
    %c0_i32_1 = arith.constant 0 : i32
    return %arg0, %arg1, %c0_i32, %c0_i32_0 : i32, i32, i32, i32
  }
}

module attributes {stable_mosaic.version = 11 : i64} {
  func.func @_linear_kernel(%arg0: i32, %arg1: i32, %arg2: i32, %arg3: memref<16x32xbf16, #tpu.memory_space<vmem>>, %arg4: memref<32x64xbf16, #tpu.memory_space<vmem>>, %arg5: memref<1x32xf32, #tpu.memory_space<vmem>>, %arg6: memref<1x32xf32, #tpu.memory_space<vmem>>, %arg7: memref<1x64xf32, #tpu.memory_space<vmem>>, %arg8: memref<16x64xbf16, #tpu.memory_space<vmem>>, %arg9: memref<16x64xf32, #tpu.memory_space<vmem>>) attributes {dimension_semantics = [#tpu.dimension_semantics<parallel>, #tpu.dimension_semantics<parallel>, #tpu.dimension_semantics<arbitrary>], iteration_bounds = array<i64: 1, 1, 1>, scalar_prefetch = 0 : i64, scratch_operands = 1 : i64, tpu.core_type = #tpu.core_type<tc>, window_params = [{transform_indices = @transform_0, window_bounds = array<i64: 16, 32>}, {transform_indices = @transform_1, window_bounds = array<i64: 32, 64>}, {transform_indices = @transform_2, window_bounds = array<i64: 1, 32>}, {transform_indices = @transform_3, window_bounds = array<i64: 1, 32>}, {transform_indices = @transform_4, window_bounds = array<i64: 1, 64>}, {transform_indices = @transform_5, window_bounds = array<i64: 16, 64>}]} {
    %c0_i32 = arith.constant 0 : i32
    %0 = arith.cmpi eq, %arg2, %c0_i32 : i32
    %1 = arith.extui %0 : i1 to i32
    %c0_i32_0 = arith.constant 0 : i32
    %2 = arith.cmpi ne, %1, %c0_i32_0 : i32
    scf.if %2 {
      %cst_19 = arith.constant 0.000000e+00 : f32
      %36 = vector.broadcast %cst_19 : f32 to vector<16x64xf32>
      %c0_20 = arith.constant 0 : index
      %c0_21 = arith.constant 0 : index
      %37 = vector.load %arg9[%c0_20, %c0_21] : memref<16x64xf32, #tpu.memory_space<vmem>>, vector<16x64xf32>
      tpu.vector_store %arg9[%c0_20, %c0_21], %36 {strides = array<i32>} : memref<16x64xf32, #tpu.memory_space<vmem>>, vector<16x64xf32>,
    } else {
    }
    %c0 = arith.constant 0 : index
    %c0_1 = arith.constant 0 : index
    %3 = vector.load %arg3[%c0, %c0_1] : memref<16x32xbf16, #tpu.memory_space<vmem>>, vector<16x32xbf16>
    %4 = arith.extf %3 : vector<16x32xbf16> to vector<16x32xf32>
    %cst = arith.constant dense<0.000000e+00> : vector<16xf32>
    %5 = vector.multi_reduction <add>, %4, %cst [1] : vector<16x32xf32> to vector<16xf32>
    %6 = vector.shape_cast %5 : vector<16xf32> to vector<16x1xf32>
    %cst_2 = arith.constant 3.200000e+01 : f32
    %7 = vector.broadcast %cst_2 : f32 to vector<16x1xf32>
    %8 = arith.divf %6, %7 : vector<16x1xf32>
    %9 = vector.broadcast %8 : vector<16x1xf32> to vector<16x32xf32>
    %10 = arith.subf %4, %9 : vector<16x32xf32>
    %11 = arith.mulf %10, %10 : vector<16x32xf32>
    %cst_3 = arith.constant dense<0.000000e+00> : vector<16xf32>
    %12 = vector.multi_reduction <add>, %11, %cst_3 [1] : vector<16x32xf32> to vector<16xf32>
    %13 = vector.shape_cast %12 : vector<16xf32> to vector<16x1xf32>
    %cst_4 = arith.constant 3.200000e+01 : f32
    %14 = vector.broadcast %cst_4 : f32 to vector<16x1xf32>
    %15 = arith.divf %13, %14 : vector<16x1xf32>
    %cst_5 = arith.constant 9.99999974E-6 : f32
    %16 = vector.broadcast %cst_5 : f32 to vector<16x1xf32>
    %17 = arith.addf %15, %16 : vector<16x1xf32>
    %18 = math.rsqrt %17 : vector<16x1xf32>
    %19 = vector.broadcast %18 : vector<16x1xf32> to vector<16x32xf32>
    %20 = arith.mulf %10, %19 : vector<16x32xf32>
    %c0_6 = arith.constant 0 : index
    %c0_7 = arith.constant 0 : index
    %21 = vector.load %arg5[%c0_6, %c0_7] : memref<1x32xf32, #tpu.memory_space<vmem>>, vector<1x32xf32>
    %22 = vector.broadcast %21 : vector<1x32xf32> to vector<16x32xf32>
    %23 = arith.mulf %20, %22 : vector<16x32xf32>
    %c0_8 = arith.constant 0 : index
    %c0_9 = arith.constant 0 : index
    %24 = vector.load %arg6[%c0_8, %c0_9] : memref<1x32xf32, #tpu.memory_space<vmem>>, vector<1x32xf32>
    %25 = vector.broadcast %24 : vector<1x32xf32> to vector<16x32xf32>
    %26 = arith.addf %23, %25 : vector<16x32xf32>
    %27 = arith.truncf %26 : vector<16x32xf32> to vector<16x32xbf16>
    %c0_10 = arith.constant 0 : index
    %c0_11 = arith.constant 0 : index
    %28 = vector.load %arg9[%c0_10, %c0_11] : memref<16x64xf32, #tpu.memory_space<vmem>>, vector<16x64xf32>
    %c0_12 = arith.constant 0 : index
    %c0_13 = arith.constant 0 : index
    %29 = vector.load %arg4[%c0_12, %c0_13] : memref<32x64xbf16, #tpu.memory_space<vmem>>, vector<32x64xbf16>
    %cst_14 = arith.constant dense<0.000000e+00> : vector<16x64xf32>
    %30 = tpu.matmul %27, %29, %cst_14 {dimension_numbers = #tpu.dot_dimension_numbers<[1], [0], [0], [1], [0, 0, 1, 1], [], []>} : vector<16x32xbf16>, vector<32x64xbf16>, vector<16x64xf32> -> vector<16x64xf32>
    %31 = arith.addf %28, %30 : vector<16x64xf32>
    %c0_15 = arith.constant 0 : index
    %c0_16 = arith.constant 0 : index
    %32 = vector.load %arg9[%c0_15, %c0_16] : memref<16x64xf32, #tpu.memory_space<vmem>>, vector<16x64xf32>
    tpu.vector_store %arg9[%c0_15, %c0_16], %31 {strides = array<i32>} : memref<16x64xf32, #tpu.memory_space<vmem>>, vector<16x64xf32>,
    %c0_i32_17 = arith.constant 0 : i32
    %33 = arith.cmpi eq, %arg2, %c0_i32_17 : i32
    %34 = arith.extui %33 : i1 to i32
    %c0_i32_18 = arith.constant 0 : i32
    %35 = arith.cmpi ne, %34, %c0_i32_18 : i32
    scf.if %35 {
      %c0_19 = arith.constant 0 : index
      %c0_20 = arith.constant 0 : index
      %36 = vector.load %arg9[%c0_19, %c0_20] : memref<16x64xf32, #tpu.memory_space<vmem>>, vector<16x64xf32>
      %c0_21 = arith.constant 0 : index
      %c0_22 = arith.constant 0 : index
      %37 = vector.load %arg7[%c0_21, %c0_22] : memref<1x64xf32, #tpu.memory_space<vmem>>, vector<1x64xf32>
      %38 = vector.broadcast %37 : vector<1x64xf32> to vector<16x64xf32>
      %39 = arith.addf %36, %38 : vector<16x64xf32>
      %cst_23 = arith.constant 0.000000e+00 : f32
      %40 = vector.broadcast %cst_23 : f32 to vector<16x64xf32>
      %41 = arith.maximumf %39, %40 : vector<16x64xf32>
      %42 = arith.truncf %41 : vector<16x64xf32> to vector<16x64xbf16>
      %c0_24 = arith.constant 0 : index
      %c0_25 = arith.constant 0 : index
      %43 = vector.load %arg8[%c0_24, %c0_25] : memref<16x64xbf16, #tpu.memory_space<vmem>>, vector<16x64xbf16>
      tpu.vector_store %arg8[%c0_24, %c0_25], %42 {strides = array<i32>} : memref<16x64xbf16, #tpu.memory_space<vmem>>, vector<16x64xbf16>,
    } else {
    }
    return
  }
  func.func @transform_0(%arg0: i32, %arg1: i32, %arg2: i32) -> (i32, i32) {
    %c0_i32 = arith.constant 0 : i32
    return %arg0, %arg2 : i32, i32
  }
  func.func @transform_1(%arg0: i32, %arg1: i32, %arg2: i32) -> (i32, i32) {
    %c0_i32 = arith.constant 0 : i32
    return %arg2, %arg1 : i32, i32
  }
  func.func @transform_2(%arg0: i32, %arg1: i32, %arg2: i32) -> (i32, i32) {
    %c0_i32 = arith.constant 0 : i32
    %c0_i32_0 = arith.constant 0 : i32
    return %c0_i32, %arg2 : i32, i32
  }
  func.func @transform_3(%arg0: i32, %arg1: i32, %arg2: i32) -> (i32, i32) {
    %c0_i32 = arith.constant 0 : i32
    %c0_i32_0 = arith.constant 0 : i32
    return %c0_i32, %arg2 : i32, i32
  }
  func.func @transform_4(%arg0: i32, %arg1: i32, %arg2: i32) -> (i32, i32) {
    %c0_i32 = arith.constant 0 : i32
    %c0_i32_0 = arith.constant 0 : i32
    return %c0_i32, %arg1 : i32, i32
  }
  func.func @transform_5(%arg0: i32, %arg1: i32, %arg2: i32) -> (i32, i32) {
    %c0_i32 = arith.constant 0 : i32
    return %arg0, %arg1 : i32, i32
  }
}

module attributes {stable_mosaic.version = 11 : i64} {
  func.func @_linear_kernel(%arg0: i32, %arg1: i32, %arg2: i32, %arg3: memref<16x64xbf16, #tpu.memory_space<vmem>>, %arg4: memref<64x32xbf16, #tpu.memory_space<vmem>>, %arg5: memref<1x32xf32, #tpu.memory_space<vmem>>, %arg6: memref<16x32xbf16, #tpu.memory_space<vmem>>, %arg7: memref<16x32xbf16, #tpu.memory_space<vmem>>, %arg8: memref<16x32xf32, #tpu.memory_space<vmem>>) attributes {dimension_semantics = [#tpu.dimension_semantics<parallel>, #tpu.dimension_semantics<parallel>, #tpu.dimension_semantics<arbitrary>], iteration_bounds = array<i64: 1, 1, 1>, scalar_prefetch = 0 : i64, scratch_operands = 1 : i64, tpu.core_type = #tpu.core_type<tc>, window_params = [{transform_indices = @transform_0, window_bounds = array<i64: 16, 64>}, {transform_indices = @transform_1, window_bounds = array<i64: 64, 32>}, {transform_indices = @transform_2, window_bounds = array<i64: 1, 32>}, {transform_indices = @transform_3, window_bounds = array<i64: 16, 32>}, {transform_indices = @transform_4, window_bounds = array<i64: 16, 32>}]} {
    %c0_i32 = arith.constant 0 : i32
    %0 = arith.cmpi eq, %arg2, %c0_i32 : i32
    %1 = arith.extui %0 : i1 to i32
    %c0_i32_0 = arith.constant 0 : i32
    %2 = arith.cmpi ne, %1, %c0_i32_0 : i32
    scf.if %2 {
      %cst_10 = arith.constant 0.000000e+00 : f32
      %12 = vector.broadcast %cst_10 : f32 to vector<16x32xf32>
      %c0_11 = arith.constant 0 : index
      %c0_12 = arith.constant 0 : index
      %13 = vector.load %arg8[%c0_11, %c0_12] : memref<16x32xf32, #tpu.memory_space<vmem>>, vector<16x32xf32>
      tpu.vector_store %arg8[%c0_11, %c0_12], %12 {strides = array<i32>} : memref<16x32xf32, #tpu.memory_space<vmem>>, vector<16x32xf32>,
    } else {
    }
    %c0 = arith.constant 0 : index
    %c0_1 = arith.constant 0 : index
    %3 = vector.load %arg3[%c0, %c0_1] : memref<16x64xbf16, #tpu.memory_space<vmem>>, vector<16x64xbf16>
    %c0_2 = arith.constant 0 : index
    %c0_3 = arith.constant 0 : index
    %4 = vector.load %arg8[%c0_2, %c0_3] : memref<16x32xf32, #tpu.memory_space<vmem>>, vector<16x32xf32>
    %c0_4 = arith.constant 0 : index
    %c0_5 = arith.constant 0 : index
    %5 = vector.load %arg4[%c0_4, %c0_5] : memref<64x32xbf16, #tpu.memory_space<vmem>>, vector<64x32xbf16>
    %cst = arith.constant dense<0.000000e+00> : vector<16x32xf32>
    %6 = tpu.matmul %3, %5, %cst {dimension_numbers = #tpu.dot_dimension_numbers<[1], [0], [0], [1], [0, 0, 1, 1], [], []>} : vector<16x64xbf16>, vector<64x32xbf16>, vector<16x32xf32> -> vector<16x32xf32>
    %7 = arith.addf %4, %6 : vector<16x32xf32>
    %c0_6 = arith.constant 0 : index
    %c0_7 = arith.constant 0 : index
    %8 = vector.load %arg8[%c0_6, %c0_7] : memref<16x32xf32, #tpu.memory_space<vmem>>, vector<16x32xf32>
    tpu.vector_store %arg8[%c0_6, %c0_7], %7 {strides = array<i32>} : memref<16x32xf32, #tpu.memory_space<vmem>>, vector<16x32xf32>,
    %c0_i32_8 = arith.constant 0 : i32
    %9 = arith.cmpi eq, %arg2, %c0_i32_8 : i32
    %10 = arith.extui %9 : i1 to i32
    %c0_i32_9 = arith.constant 0 : i32
    %11 = arith.cmpi ne, %10, %c0_i32_9 : i32
    scf.if %11 {
      %c0_10 = arith.constant 0 : index
      %c0_11 = arith.constant 0 : index
      %12 = vector.load %arg8[%c0_10, %c0_11] : memref<16x32xf32, #tpu.memory_space<vmem>>, vector<16x32xf32>
      %c0_12 = arith.constant 0 : index
      %c0_13 = arith.constant 0 : index
      %13 = vector.load %arg5[%c0_12, %c0_13] : memref<1x32xf32, #tpu.memory_space<vmem>>, vector<1x32xf32>
      %14 = vector.broadcast %13 : vector<1x32xf32> to vector<16x32xf32>
      %15 = arith.addf %12, %14 : vector<16x32xf32>
      %c0_14 = arith.constant 0 : index
      %c0_15 = arith.constant 0 : index
      %16 = vector.load %arg6[%c0_14, %c0_15] : memref<16x32xbf16, #tpu.memory_space<vmem>>, vector<16x32xbf16>
      %17 = arith.extf %16 : vector<16x32xbf16> to vector<16x32xf32>
      %18 = arith.addf %15, %17 : vector<16x32xf32>
      %19 = arith.truncf %18 : vector<16x32xf32> to vector<16x32xbf16>
      %c0_16 = arith.constant 0 : index
      %c0_17 = arith.constant 0 : index
      %20 = vector.load %arg7[%c0_16, %c0_17] : memref<16x32xbf16, #tpu.memory_space<vmem>>, vector<16x32xbf16>
      tpu.vector_store %arg7[%c0_16, %c0_17], %19 {strides = array<i32>} : memref<16x32xbf16, #tpu.memory_space<vmem>>, vector<16x32xbf16>,
    } else {
    }
    return
  }
  func.func @transform_0(%arg0: i32, %arg1: i32, %arg2: i32) -> (i32, i32) {
    %c0_i32 = arith.constant 0 : i32
    return %arg0, %arg2 : i32, i32
  }
  func.func @transform_1(%arg0: i32, %arg1: i32, %arg2: i32) -> (i32, i32) {
    %c0_i32 = arith.constant 0 : i32
    return %arg2, %arg1 : i32, i32
  }
  func.func @transform_2(%arg0: i32, %arg1: i32, %arg2: i32) -> (i32, i32) {
    %c0_i32 = arith.constant 0 : i32
    %c0_i32_0 = arith.constant 0 : i32
    return %c0_i32, %arg1 : i32, i32
  }
  func.func @transform_3(%arg0: i32, %arg1: i32, %arg2: i32) -> (i32, i32) {
    %c0_i32 = arith.constant 0 : i32
    return %arg0, %arg1 : i32, i32
  }
  func.func @transform_4(%arg0: i32, %arg1: i32, %arg2: i32) -> (i32, i32) {
    %c0_i32 = arith.constant 0 : i32
    return %arg0, %arg1 : i32, i32
  }
}

module attributes {stable_mosaic.version = 11 : i64} {
  func.func @_linear_kernel(%arg0: i32, %arg1: i32, %arg2: i32, %arg3: memref<16x32xbf16, #tpu.memory_space<vmem>>, %arg4: memref<32x64xbf16, #tpu.memory_space<vmem>>, %arg5: memref<1x32xf32, #tpu.memory_space<vmem>>, %arg6: memref<1x32xf32, #tpu.memory_space<vmem>>, %arg7: memref<16x64xf32, #tpu.memory_space<vmem>>, %arg8: memref<16x64xf32, #tpu.memory_space<vmem>>) attributes {dimension_semantics = [#tpu.dimension_semantics<parallel>, #tpu.dimension_semantics<parallel>, #tpu.dimension_semantics<arbitrary>], iteration_bounds = array<i64: 1, 1, 1>, scalar_prefetch = 0 : i64, scratch_operands = 1 : i64, tpu.core_type = #tpu.core_type<tc>, window_params = [{transform_indices = @transform_0, window_bounds = array<i64: 16, 32>}, {transform_indices = @transform_1, window_bounds = array<i64: 32, 64>}, {transform_indices = @transform_2, window_bounds = array<i64: 1, 32>}, {transform_indices = @transform_3, window_bounds = array<i64: 1, 32>}, {transform_indices = @transform_4, window_bounds = array<i64: 16, 64>}]} {
    %c0_i32 = arith.constant 0 : i32
    %0 = arith.cmpi eq, %arg2, %c0_i32 : i32
    %1 = arith.extui %0 : i1 to i32
    %c0_i32_0 = arith.constant 0 : i32
    %2 = arith.cmpi ne, %1, %c0_i32_0 : i32
    scf.if %2 {
      %cst_19 = arith.constant 0.000000e+00 : f32
      %36 = vector.broadcast %cst_19 : f32 to vector<16x64xf32>
      %c0_20 = arith.constant 0 : index
      %c0_21 = arith.constant 0 : index
      %37 = vector.load %arg8[%c0_20, %c0_21] : memref<16x64xf32, #tpu.memory_space<vmem>>, vector<16x64xf32>
      tpu.vector_store %arg8[%c0_20, %c0_21], %36 {strides = array<i32>} : memref<16x64xf32, #tpu.memory_space<vmem>>, vector<16x64xf32>,
    } else {
    }
    %c0 = arith.constant 0 : index
    %c0_1 = arith.constant 0 : index
    %3 = vector.load %arg3[%c0, %c0_1] : memref<16x32xbf16, #tpu.memory_space<vmem>>, vector<16x32xbf16>
    %4 = arith.extf %3 : vector<16x32xbf16> to vector<16x32xf32>
    %cst = arith.constant dense<0.000000e+00> : vector<16xf32>
    %5 = vector.multi_reduction <add>, %4, %cst [1] : vector<16x32xf32> to vector<16xf32>
    %6 = vector.shape_cast %5 : vector<16xf32> to vector<16x1xf32>
    %cst_2 = arith.constant 3.200000e+01 : f32
    %7 = vector.broadcast %cst_2 : f32 to vector<16x1xf32>
    %8 = arith.divf %6, %7 : vector<16x1xf32>
    %9 = vector.broadcast %8 : vector<16x1xf32> to vector<16x32xf32>
    %10 = arith.subf %4, %9 : vector<16x32xf32>
    %11 = arith.mulf %10, %10 : vector<16x32xf32>
    %cst_3 = arith.constant dense<0.000000e+00> : vector<16xf32>
    %12 = vector.multi_reduction <add>, %11, %cst_3 [1] : vector<16x32xf32> to vector<16xf32>
    %13 = vector.shape_cast %12 : vector<16xf32> to vector<16x1xf32>
    %cst_4 = arith.constant 3.200000e+01 : f32
    %14 = vector.broadcast %cst_4 : f32 to vector<16x1xf32>
    %15 = arith.divf %13, %14 : vector<16x1xf32>
    %cst_5 = arith.constant 9.99999974E-6 : f32
    %16 = vector.broadcast %cst_5 : f32 to vector<16x1xf32>
    %17 = arith.addf %15, %16 : vector<16x1xf32>
    %18 = math.rsqrt %17 : vector<16x1xf32>
    %19 = vector.broadcast %18 : vector<16x1xf32> to vector<16x32xf32>
    %20 = arith.mulf %10, %19 : vector<16x32xf32>
    %c0_6 = arith.constant 0 : index
    %c0_7 = arith.constant 0 : index
    %21 = vector.load %arg5[%c0_6, %c0_7] : memref<1x32xf32, #tpu.memory_space<vmem>>, vector<1x32xf32>
    %22 = vector.broadcast %21 : vector<1x32xf32> to vector<16x32xf32>
    %23 = arith.mulf %20, %22 : vector<16x32xf32>
    %c0_8 = arith.constant 0 : index
    %c0_9 = arith.constant 0 : index
    %24 = vector.load %arg6[%c0_8, %c0_9] : memref<1x32xf32, #tpu.memory_space<vmem>>, vector<1x32xf32>
    %25 = vector.broadcast %24 : vector<1x32xf32> to vector<16x32xf32>
    %26 = arith.addf %23, %25 : vector<16x32xf32>
    %27 = arith.truncf %26 : vector<16x32xf32> to vector<16x32xbf16>
    %c0_10 = arith.constant 0 : index
    %c0_11 = arith.constant 0 : index
    %28 = vector.load %arg8[%c0_10, %c0_11] : memref<16x64xf32, #tpu.memory_space<vmem>>, vector<16x64xf32>
    %c0_12 = arith.constant 0 : index
    %c0_13 = arith.constant 0 : index
    %29 = vector.load %arg4[%c0_12, %c0_13] : memref<32x64xbf16, #tpu.memory_space<vmem>>, vector<32x64xbf16>
    %cst_14 = arith.constant dense<0.000000e+00> : vector<16x64xf32>
    %30 = tpu.matmul %27, %29, %cst_14 {dimension_numbers = #tpu.dot_dimension_numbers<[1], [0], [0], [1], [0, 0, 1, 1], [], []>} : vector<16x32xbf16>, vector<32x64xbf16>, vector<16x64xf32> -> vector<16x64xf32>
    %31 = arith.addf %28, %30 : vector<16x64xf32>
    %c0_15 = arith.constant 0 : index
    %c0_16 = arith.constant 0 : index
    %32 = vector.load %arg8[%c0_15, %c0_16] : memref<16x64xf32, #tpu.memory_space<vmem>>, vector<16x64xf32>
    tpu.vector_store %arg8[%c0_15, %c0_16], %31 {strides = array<i32>} : memref<16x64xf32, #tpu.memory_space<vmem>>, vector<16x64xf32>,
    %c0_i32_17 = arith.constant 0 : i32
    %33 = arith.cmpi eq, %arg2, %c0_i32_17 : i32
    %34 = arith.extui %33 : i1 to i32
    %c0_i32_18 = arith.constant 0 : i32
    %35 = arith.cmpi ne, %34, %c0_i32_18 : i32
    scf.if %35 {
      %c0_19 = arith.constant 0 : index
      %c0_20 = arith.constant 0 : index
      %36 = vector.load %arg8[%c0_19, %c0_20] : memref<16x64xf32, #tpu.memory_space<vmem>>, vector<16x64xf32>
      %c0_21 = arith.constant 0 : index
      %c0_22 = arith.constant 0 : index
      %37 = vector.load %arg7[%c0_21, %c0_22] : memref<16x64xf32, #tpu.memory_space<vmem>>, vector<16x64xf32>
      tpu.vector_store %arg7[%c0_21, %c0_22], %36 {strides = array<i32>} : memref<16x64xf32, #tpu.memory_space<vmem>>, vector<16x64xf32>,
    } else {
    }
    return
  }
  func.func @transform_0(%arg0: i32, %arg1: i32, %arg2: i32) -> (i32, i32) {
    %c0_i32 = arith.constant 0 : i32
    return %arg0, %arg2 : i32, i32
  }
  func.func @transform_1(%arg0: i32, %arg1: i32, %arg2: i32) -> (i32, i32) {
    %c0_i32 = arith.constant 0 : i32
    return %arg2, %arg1 : i32, i32
  }
  func.func @transform_2(%arg0: i32, %arg1: i32, %arg2: i32) -> (i32, i32) {
    %c0_i32 = arith.constant 0 : i32
    %c0_i32_0 = arith.constant 0 : i32
    return %c0_i32, %arg2 : i32, i32
  }
  func.func @transform_3(%arg0: i32, %arg1: i32, %arg2: i32) -> (i32, i32) {
    %c0_i32 = arith.constant 0 : i32
    %c0_i32_0 = arith.constant 0 : i32
    return %c0_i32, %arg2 : i32, i32
  }
  func.func @transform_4(%arg0: i32, %arg1: i32, %arg2: i32) -> (i32, i32) {
    %c0_i32 = arith.constant 0 : i32
    return %arg0, %arg1 : i32, i32
  }
}

</mosaic_0001>

<bundles_post_ra>
// kernel: decoder_forward.21
= control target key start
LH: loop header
LB: loop body
LE: loop exit
PB: predicated region body
PF: predicated region fallthrough
CT: control target
= control target key end

     0   :  { %vm22_vm0 = vcmask 261120   ;;  %v163_v0 = vmov 0.0   ;;  %vm164_vm1 = vmmov 0   ;;  %vm127_vm2 = vcmask 257024   ;;  %s216_s1 = inlined_call_operand.vmem [shape: bf16[32,32], index: 1, kind: input, shape index: {}]   ;;  %s217_s0 = inlined_call_operand.vmem [shape: bf16[16,32], index: 0, kind: input, shape index: {}]   ;;  %s218_s3 = inlined_call_operand.vmem [shape: bf16[16,32], index: 3, kind: input, shape index: {}]   ;;  %s219_s2 = inlined_call_operand.vmem [shape: f32[1,32], index: 2, kind: input, shape index: {}]   ;;  %s220_s4 = inlined_call_operand.vmem [shape: bf16[16,32], index: 4, kind: output, shape index: {}]  }
   0x1   :  { %150 = vmatprep.subr.bf16.mxu0 %v163_v0  ;;  %v160_v1 = vld [vmem:[%s216_s1 + $0x8] sm:$0xff]   ;;  %154 = vmatprep.mubr.msk.bf16.mxu0 %vm164_vm1, %v163_v0  ;;  %23 = vst.msk [vmem:[#allocation2] sm:$0xff] %vm22_vm0, %v163_v0  ;;  %24 = vst.msk [vmem:[#allocation2 + $0x8] sm:$0xff] %vm22_vm0, %v163_v0  ;;  %v161_v2 = vld [vmem:[%s216_s1] sm:$0xff]  }
   0x2   :  { %151 = vmatpush3.bf16.msra.mxu0 %v160_v1  ;;  %v162_v3 = vld [vmem:[%s217_s0] sm:$0xff]  }
   0x3   :  { %152 = vmatprep.subr.bf16.mxu0 %v163_v0  ;;  %v144_v11 = vld [vmem:[%s218_s3] sm:$0xff]  }
   0x4   :  { %v138_v13 = vld [vmem:[%s219_s2] ss:$0 sm:$0xff]  ;;  %v145_v14 = vunpack.c.l.bf16 %v144_v11  ;;  %v146_v18 = vunpack.c.h.bf16 %v144_v11 }
   0x6   :  { %153 = vmatpush3.bf16.msra.mxu0 %v161_v2 }
   0x8   :  { %v27_v4 = vld [vmem:[#allocation2] sm:$0xff]  ;;  %v28_v8 = vld [vmem:[#allocation2 + $0x8] sm:$0xff] }
   0x9   :  { %155 = vmatmul.mubr.msk.bf16.vlgmr.msra.gmra.mxu0 %vm22_vm0, %v162_v3 }
  0xc9   :  { %v88_v5 = vpop.f32.mrf.mxu0 }
  0xca   :  { %v95_v6 = vadd.f32 %v88_v5, %v27_v4 }
  0xcb   :  { %v156_v7 = vpop.f32.mrf.mxu0 }
  0xcc   :  { %97 = vst.msk [vmem:[#allocation2] sm:$0xff] %vm22_vm0, %v95_v6 }
  0xcd   :  { %v91_v9 = vpop.f32.mrf.mxu0 }
  0xce   :  { %v96_v10 = vadd.f32 %v91_v9, %v28_v8 }
  0xcf   :  { %v157_v12 = vpop.f32.mrf.mxu0 }
  0xd0   :  { %98 = vst.msk [vmem:[#allocation2 + $0x8] sm:$0xff] %vm22_vm0, %v96_v10 }
  0xd3   :  { %v102_v15 = vld [vmem:[#allocation2] sm:$0xff] }
  0xd4   :  { %v111_v16 = vadd.f32 %v138_v13, %v102_v15 }
  0xd6   :  { %v117_v17 = vadd.f32 %v145_v14, %v111_v16 }
  0xd7   :  { %v103_v19 = vld [vmem:[#allocation2 + $0x8] sm:$0xff] }
  0xd8   :  { %v141_v20 = vpack.c.bf16 %v117_v17, %v117_v17  ;;  %v112_v21 = vadd.f32 %v138_v13, %v103_v19 }
  0xda   :  { %128 = vst.msk [vmem:[%s220_s4] sm:$0xf] %vm127_vm2, %v141_v20  ;;  %v118_v22 = vadd.f32 %v146_v18, %v112_v21 }
  0xdc   :  { %v142_v23 = vpack.c.bf16 %v118_v22, %v118_v22 }
  0xde   :  { %129 = vst.msk [vmem:[%s220_s4 + $0x4] sm:$0xf] %vm127_vm2, %v142_v23 }

// kernel: decoder_forward.22
= control target key start
LH: loop header
LB: loop body
LE: loop exit
PB: predicated region body
PF: predicated region fallthrough
CT: control target
= control target key end

     0   :  { %vm25_vm0 = vcmask 261120   ;;  %v207_v15 = vmov 0.0   ;;  %vm208_vm1 = vmmov 0   ;;  %vm167_vm2 = vcmask 257024   ;;  %s272_s0 = inlined_call_operand.vmem [shape: bf16[16,32], index: 0, kind: input, shape index: {}]   ;;  %s273_s1 = inlined_call_operand.vmem [shape: bf16[32,32], index: 1, kind: input, shape index: {}]   ;;  %s274_s2 = inlined_call_operand.vmem [shape: f32[1,32], index: 2, kind: input, shape index: {}]   ;;  %s275_s3 = inlined_call_operand.vmem [shape: f32[1,32], index: 3, kind: input, shape index: {}]   ;;  %s276_s4 = inlined_call_operand.vmem [shape: f32[1,32], index: 4, kind: input, shape index: {}]   ;;  %s277_s5 = inlined_call_operand.vmem [shape: bf16[16,32], index: 5, kind: output, shape index: {}]  }
   0x1   :  { %v185_v0 = vld [vmem:[%s272_s0] sm:$0xff]   ;;  %191 = vmatprep.subr.bf16.mxu0 %v207_v15  ;;  %26 = vst.msk [vmem:[#allocation2] sm:$0xff] %vm25_vm0, %v207_v15  ;;  %27 = vst.msk [vmem:[#allocation2 + $0x8] sm:$0xff] %vm25_vm0, %v207_v15  ;;  %v201_v16 = vld [vmem:[%s273_s1 + $0x8] sm:$0xff]   ;;  %195 = vmatprep.mubr.msk.bf16.mxu0 %vm208_vm1, %v207_v15 }
   0x2   :  { %v186_v1 = vunpack.c.l.bf16 %v185_v0  ;;  %v187_v2 = vunpack.c.h.bf16 %v185_v0  ;;  %192 = vmatpush3.bf16.msra.mxu0 %v201_v16  ;;  %v202_v17 = vld [vmem:[%s273_s1] sm:$0xff]  }
   0x3   :  { %193 = vmatprep.subr.bf16.mxu0 %v207_v15  ;;  %v174_v26 = vld [vmem:[%s274_s2] ss:$0 sm:$0xff] }
   0x4   :  { %v33_v3 = vsel %vm25_vm0, %v186_v1, 0.0  ;;  %v36_v4 = vsel %vm25_vm0, %v187_v2, 0.0  ;;  %v175_v30 = vld [vmem:[%s275_s3] ss:$0 sm:$0xff] }
   0x5   :  { %34 = vadd.xlane.f32.xlu0 %v33_v3  ;;  %v179_v43 = vld [vmem:[%s276_s4] ss:$0 sm:$0xff] }
   0x6   :  { %194 = vmatpush3.bf16.msra.mxu0 %v202_v17 }
   0x8   :  { %v79_v35 = vld [vmem:[#allocation2] sm:$0xff]  ;;  %v80_v39 = vld [vmem:[#allocation2 + $0x8] sm:$0xff] }
   0x9   :  { %37 = vadd.xlane.f32.xlu0 %v36_v4 }
  0x8e   :  { %v35_v5 = vpop.xlane.xlu0 %34 }
  0x8f   :  { %v40_v6 = vmul.f32 0.03125, %v35_v5 }
  0x91   :  { %v42_v7 = vsub.f32 %v186_v1, %v40_v6 }
  0x92   :  { %v38_v8 = vpop.xlane.xlu0 %37 }
  0x93   :  { %v41_v9 = vmul.f32 0.03125, %v38_v8  ;;  %v44_v10 = vmul.f32 %v42_v7, %v42_v7 }
  0x95   :  { %v43_v11 = vsub.f32 %v187_v2, %v41_v9  ;;  %v46_v12 = vsel %vm25_vm0, %v44_v10, 0.0 }
  0x96   :  { %47 = vadd.xlane.f32.xlu1 %v46_v12 }
  0x97   :  { %v45_v13 = vmul.f32 %v43_v11, %v43_v11 }
  0x99   :  { %v49_v14 = vsel %vm25_vm0, %v45_v13, 0.0 }
  0x9a   :  { %50 = vadd.xlane.f32.xlu1 %v49_v14 }
 0x11f   :  { %v48_v18 = vpop.xlane.xlu1 %47 }
 0x120   :  { %v52_v19 = vmul.f32 0.03125, %v48_v18 }
 0x122   :  { %v54_v20 = vadd.f32 1e-05, %v52_v19 }
 0x123   :  { %v51_v21 = vpop.xlane.xlu1 %50 }
 0x124   :  { %203 = vrsqrt.f32 %v54_v20  ;;  %v53_v22 = vmul.f32 0.03125, %v51_v21 }
 0x126   :  { %v55_v23 = vadd.f32 1e-05, %v53_v22 }
 0x128   :  { %205 = vrsqrt.f32 %v55_v23 }
 0x131   :  { %v204_v24 = vpop.eup %203 }
 0x132   :  { %v58_v25 = vmul.f32 %v204_v24, %v42_v7 }
 0x134   :  { %v67_v29 = vmul.f32 %v174_v26, %v58_v25 }
 0x135   :  { %v206_v27 = vpop.eup %205 }
 0x136   :  { %v59_v28 = vmul.f32 %v206_v27, %v43_v11  ;;  %v76_v32 = vadd.f32 %v175_v30, %v67_v29 }
 0x138   :  { %v68_v31 = vmul.f32 %v174_v26, %v59_v28 }
 0x13a   :  { %v77_v33 = vadd.f32 %v175_v30, %v68_v31 }
 0x13c   :  { %v78_v34 = vpack.c.bf16 %v77_v33, %v76_v32 }
 0x13e   :  { %196 = vmatmul.mubr.msk.bf16.vlgmr.msra.gmra.mxu0 %vm25_vm0, %v78_v34 }
 0x1fe   :  { %v134_v36 = vpop.f32.mrf.mxu0 }
 0x1ff   :  { %v141_v37 = vadd.f32 %v134_v36, %v79_v35 }
 0x200   :  { %v197_v38 = vpop.f32.mrf.mxu0 }
 0x201   :  { %143 = vst.msk [vmem:[#allocation2] sm:$0xff] %vm25_vm0, %v141_v37 }
 0x202   :  { %v137_v40 = vpop.f32.mrf.mxu0 }
 0x203   :  { %v142_v41 = vadd.f32 %v137_v40, %v80_v39 }
 0x204   :  { %v198_v42 = vpop.f32.mrf.mxu0 }
 0x205   :  { %144 = vst.msk [vmem:[#allocation2 + $0x8] sm:$0xff] %vm25_vm0, %v142_v41 }
 0x208   :  { %v148_v44 = vld [vmem:[#allocation2] sm:$0xff] }
 0x209   :  { %v157_v45 = vadd.f32 %v179_v43, %v148_v44 }
 0x20b   :  { %v182_v46 = vpack.c.bf16 %v157_v45, %v157_v45 }
 0x20c   :  { %v149_v47 = vld [vmem:[#allocation2 + $0x8] sm:$0xff] }
 0x20d   :  { %168 = vst.msk [vmem:[%s277_s5] sm:$0xf] %vm167_vm2, %v182_v46  ;;  %v158_v48 = vadd.f32 %v179_v43, %v149_v47 }
 0x20f   :  { %v183_v49 = vpack.c.bf16 %v158_v48, %v158_v48 }
 0x211   :  { %169 = vst.msk [vmem:[%s277_s5 + $0x4] sm:$0xf] %vm167_vm2, %v183_v49 }

// kernel: decoder_forward.19
= control target key start
LH: loop header
LB: loop body
LE: loop exit
PB: predicated region body
PF: predicated region fallthrough
CT: control target
= control target key end

     0   :  { %vm32_vm0 = vcmask 261120   ;;  %v208_v15 = vmov 0.0   ;;  %vm209_vm1 = vmmov 0   ;;  %vm25_vm2 = vcmask 785408   ;;  %s273_s0 = inlined_call_operand.vmem [shape: bf16[16,32], index: 0, kind: input, shape index: {}]   ;;  %s274_s1 = inlined_call_operand.vmem [shape: bf16[32,96], index: 1, kind: input, shape index: {}]   ;;  %s275_s2 = inlined_call_operand.vmem [shape: f32[1,32], index: 2, kind: input, shape index: {}]   ;;  %s276_s3 = inlined_call_operand.vmem [shape: f32[1,32], index: 3, kind: input, shape index: {}]   ;;  %s277_s4 = inlined_call_operand.vmem [shape: f32[1,96], index: 4, kind: input, shape index: {}]   ;;  %s278_s5 = inlined_call_operand.vmem [shape: bf16[16,96], index: 5, kind: output, shape index: {}]  }
   0x1   :  { %v186_v0 = vld [vmem:[%s273_s0] sm:$0xff]   ;;  %192 = vmatprep.subr.bf16.mxu0 %v208_v15  ;;  %v202_v16 = vld [vmem:[%s274_s1 + $0x8] sm:$0xff]   ;;  %196 = vmatprep.mubr.msk.bf16.mxu0 %vm209_vm1, %v208_v15  ;;  %26 = vst.msk [vmem:[#allocation2] sm:$0xff] %vm25_vm2, %v208_v15  ;;  %27 = vst.msk [vmem:[#allocation2 + $0x8] sm:$0xff] %vm25_vm2, %v208_v15  ;;  %vm168_vm3 = vcmask 781312  }
   0x2   :  { %v187_v1 = vunpack.c.l.bf16 %v186_v0  ;;  %v188_v2 = vunpack.c.h.bf16 %v186_v0  ;;  %193 = vmatpush3.bf16.msra.mxu0 %v202_v16  ;;  %v203_v17 = vld [vmem:[%s274_s1] sm:$0xff]  }
   0x3   :  { %194 = vmatprep.subr.bf16.mxu0 %v208_v15  ;;  %v175_v26 = vld [vmem:[%s275_s2] ss:$0 sm:$0xff] }
   0x4   :  { %v33_v3 = vsel %vm32_vm0, %v187_v1, 0.0  ;;  %v36_v4 = vsel %vm32_vm0, %v188_v2, 0.0  ;;  %v176_v30 = vld [vmem:[%s276_s3] ss:$0 sm:$0xff] }
   0x5   :  { %34 = vadd.xlane.f32.xlu0 %v33_v3  ;;  %v180_v43 = vld [vmem:[%s277_s4] ss:$0 sm:$0xff] }
   0x6   :  { %195 = vmatpush3.bf16.msra.mxu0 %v203_v17 }
   0x8   :  { %v79_v35 = vld [vmem:[#allocation2] sm:$0xff]  ;;  %v80_v39 = vld [vmem:[#allocation2 + $0x8] sm:$0xff] }
   0x9   :  { %37 = vadd.xlane.f32.xlu0 %v36_v4 }
  0x8e   :  { %v35_v5 = vpop.xlane.xlu0 %34 }
  0x8f   :  { %v40_v6 = vmul.f32 0.03125, %v35_v5 }
  0x91   :  { %v42_v7 = vsub.f32 %v187_v1, %v40_v6 }
  0x92   :  { %v38_v8 = vpop.xlane.xlu0 %37 }
  0x93   :  { %v41_v9 = vmul.f32 0.03125, %v38_v8  ;;  %v44_v10 = vmul.f32 %v42_v7, %v42_v7 }
  0x95   :  { %v43_v11 = vsub.f32 %v188_v2, %v41_v9  ;;  %v46_v12 = vsel %vm32_vm0, %v44_v10, 0.0 }
  0x96   :  { %47 = vadd.xlane.f32.xlu1 %v46_v12 }
  0x97   :  { %v45_v13 = vmul.f32 %v43_v11, %v43_v11 }
  0x99   :  { %v49_v14 = vsel %vm32_vm0, %v45_v13, 0.0 }
  0x9a   :  { %50 = vadd.xlane.f32.xlu1 %v49_v14 }
 0x11f   :  { %v48_v18 = vpop.xlane.xlu1 %47 }
 0x120   :  { %v52_v19 = vmul.f32 0.03125, %v48_v18 }
 0x122   :  { %v54_v20 = vadd.f32 1e-05, %v52_v19 }
 0x123   :  { %v51_v21 = vpop.xlane.xlu1 %50 }
 0x124   :  { %204 = vrsqrt.f32 %v54_v20  ;;  %v53_v22 = vmul.f32 0.03125, %v51_v21 }
 0x126   :  { %v55_v23 = vadd.f32 1e-05, %v53_v22 }
 0x128   :  { %206 = vrsqrt.f32 %v55_v23 }
 0x131   :  { %v205_v24 = vpop.eup %204 }
 0x132   :  { %v58_v25 = vmul.f32 %v205_v24, %v42_v7 }
 0x134   :  { %v67_v29 = vmul.f32 %v175_v26, %v58_v25 }
 0x135   :  { %v207_v27 = vpop.eup %206 }
 0x136   :  { %v59_v28 = vmul.f32 %v207_v27, %v43_v11  ;;  %v76_v32 = vadd.f32 %v176_v30, %v67_v29 }
 0x138   :  { %v68_v31 = vmul.f32 %v175_v26, %v59_v28 }
 0x13a   :  { %v77_v33 = vadd.f32 %v176_v30, %v68_v31 }
 0x13c   :  { %v78_v34 = vpack.c.bf16 %v77_v33, %v76_v32 }
 0x13e   :  { %197 = vmatmul.mubr.msk.bf16.vlgmr.msra.gmra.mxu0 %vm32_vm0, %v78_v34 }
 0x1fe   :  { %v134_v36 = vpop.f32.mrf.mxu0 }
 0x1ff   :  { %v141_v37 = vadd.f32 %v134_v36, %v79_v35 }
 0x200   :  { %v198_v38 = vpop.f32.mrf.mxu0 }
 0x201   :  { %144 = vst.msk [vmem:[#allocation2] sm:$0xff] %vm25_vm2, %v141_v37 }
 0x202   :  { %v137_v40 = vpop.f32.mrf.mxu0 }
 0x203   :  { %v142_v41 = vadd.f32 %v137_v40, %v80_v39 }
 0x204   :  { %v199_v42 = vpop.f32.mrf.mxu0 }
 0x205   :  { %145 = vst.msk [vmem:[#allocation2 + $0x8] sm:$0xff] %vm25_vm2, %v142_v41 }
 0x208   :  { %v149_v44 = vld [vmem:[#allocation2] sm:$0xff] }
 0x209   :  { %v158_v45 = vadd.f32 %v180_v43, %v149_v44 }
 0x20b   :  { %v183_v46 = vpack.c.bf16 %v158_v45, %v158_v45 }
 0x20c   :  { %v150_v47 = vld [vmem:[#allocation2 + $0x8] sm:$0xff] }
 0x20d   :  { %169 = vst.msk [vmem:[%s278_s5] sm:$0xf] %vm168_vm3, %v183_v46  ;;  %v159_v48 = vadd.f32 %v180_v43, %v150_v47 }
 0x20f   :  { %v184_v49 = vpack.c.bf16 %v159_v48, %v159_v48 }
 0x211   :  { %170 = vst.msk [vmem:[%s278_s5 + $0x4] sm:$0xf] %vm168_vm3, %v184_v49 }

// kernel: decoder_forward.20
= control target key start
LH: loop header
LB: loop body
LE: loop exit
PB: predicated region body
PF: predicated region fallthrough
CT: control target
= control target key end

     0   :  { %s709_s15 = smov 0   ;;  %s711_s16 = smov 0   ;;  %s780_s0 = inlined_call_operand.vmem [shape: f32[2,1,8], index: 0, kind: input, shape index: {}]   ;;  %s781_s1 = inlined_call_operand.vmem [shape: bf16[2,4,8,8], index: 1, kind: input, shape index: {}]   ;;  %s782_s2 = inlined_call_operand.vmem [shape: bf16[2,4,8,8], index: 2, kind: input, shape index: {}]   ;;  %s783_s3 = inlined_call_operand.vmem [shape: bf16[2,4,8,8], index: 3, kind: input, shape index: {}]   ;;  %s784_s4 = inlined_call_operand.vmem [shape: bf16[2,4,8,8], index: 4, kind: output, shape index: {}]  }
   0x1   :  { %s713_s17 = smov 0   ;;  %s715_s18 = smov 0  }
   0x2   :  { %s717_s19 = smov 0  }
   0x3 LB: > { %s23_s20 = sadd.s32 1, %s672_s17  ;;  %s26_s21 = sadd.s32 1, %s676_s18  ;;  %s680_s19 = sphi %s717_s19, %s14_s19   ;;  %s676_s18 = sphi %s715_s18, %s788_s18   ;;  %s672_s17 = sphi %s713_s17, %s787_s17   ;;  %s668_s16 = sphi %s711_s16, %s786_s16   ;;  %s664_s15 = sphi %s709_s15, %s785_s15  }
   0x4   : > { %p24_p0 = scmp.ge.s32.totalorder %s23_s20, 4  ;;  %p566_p1 = scmp.ge.s32.totalorder %s680_s19, 1 }
   0x5   : > { %p219_p2 = scmp.lt.s32.totalorder %s680_s19, 9 }
   0x6   : > { %s790_s20 = smov (%p24_p0, %s23_s20), 0  ;;  %s792_s21 = smov (!%p24_p0, %s26_s21), %s676_s18 }
   0x7   : > { %p220_p3 = pnand %p566_p1, %p219_p2  ;;  %p28_p4 = scmp.ge.s32.totalorder %s792_s21, 2 }
   0x8   : > { %p270_p5 = scmp.lt.s32.totalorder (!%p220_p3), %s668_s16, 1  ;;  %p275_p6 = scmp.lt.s32.totalorder (!%p220_p3), %s664_s15, 3 }
   0x9   : > { %s794_s21 = smov (%p28_p4, %s792_s21), 0  ;;  %223 = sbr.rel (%p220_p3) target bundleno = 582 (0x246), region = 36 }
   0xe   : > { %v682_v0 = vmov 0.0   ;;  %vm683_vm0 = vmmov 0   ;;  %s796_s16 = smov (!%p270_p5, %s668_s16), 1  ;;  %s798_s15 = smov (!%p275_p6, %s664_s15), 3  ;;  %vm316_vm1 = vcmask 64512   ;;  %v363_v4 = vlaneseq }
   0xf   : > { %584 = vmatprep.subr.bf16.mxu0 %v682_v0  ;;  %586 = vmatprep.mubr.msk.bf16.mxu0 %vm683_vm0, %v682_v0  ;;  %s567_s22 = sshll.u32 %s796_s16, 2  ;;  %s272_s7 = scalar_lea.vmem %s780_s0, %s796_s16  ;;  %vm382_vm3 = vcmask 1043456   ;;  %vm429_vm4 = vcmask 60416  }
  0x10   : > { %590 = vmatprep.subr.bf16.mxu1 %v682_v0  ;;  %592 = vmatprep.mubr.msk.bf16.mxu1 %vm683_vm0, %v682_v0  ;;  %s278_s23 = sadd.s32 %s567_s22, %s798_s15  ;;  %v364_v5 = vshrl.u32 %v363_v4, 7  ;;  %v366_v6 = vand.u32 127, %v363_v4  ;;  %v575_v7 = vld [vmem:[%s272_s7] ss:$0 sm:$0xff] }
  0x11   : > { %s739_s24 = sshll.u32 %s278_s23, 2 }
  0x12   : > { %s288_s27 = scalar_lea.vmem %s782_s2, %s739_s24  ;;  %s280_s30 = scalar_lea.vmem %s781_s1, %s739_s24  ;;  %vm367_vm2 = vcmp.gt.s32.totalorder %v366_v6, %v364_v5 }
  0x13   : > { %v307_v1 = vld [vmem:[%s288_s27] sm:$0xf]  ;;  %s296_s10 = scalar_lea.vmem %s783_s3, %s739_s24  ;;  %s304_s13 = scalar_lea.vmem %s784_s4, %s739_s24 }
  0x14   : > { %v321_v2 = vsel %vm316_vm1, %v307_v1, 0  ;;  %v306_v3 = vld [vmem:[%s280_s30] sm:$0xf] }
  0x15   : > { %585 = vmatpush3.bf16.xpose.msra.mxu0 %v321_v2  ;;  %v308_v15 = vld [vmem:[%s296_s10] sm:$0xf] }
  0x16   : > { %v384_v16 = vsel %vm382_vm3, %v308_v15, 0 }
  0x17   : > { %591 = vmatpush3.bf16.msra.mxu1 %v384_v16 }
  0x1c   : > { %587 = vmatmul.mubr.msk.bf16.vlgmr.msra.gmra.mxu0 %vm316_vm1, %v306_v3 }
  0xdc   : > { %v357_v8 = vpop.f32.mrf.mxu0 }
  0xdd   : > { %v358_v9 = vadd.f32 %v575_v7, %v357_v8 }
  0xde   : > { %v588_v10 = vpop.f32.mrf.mxu0 }
  0xdf   : > { %v368_v11 = vsel %vm367_vm2, -1e+30, %v358_v9 }
  0xe0   : > { %v360_v12 = vpop.f32.mrf.mxu0  ;;  %v369_v13 = vsel %vm316_vm1, %v368_v11, -inf }
  0xe1   : > { %370 = vmax.xlane.f32.xlu0 %v369_v13 }
  0xe2   : > { %v589_v14 = vpop.f32.mrf.mxu0 }
 0x16a   : > { %v371_v17 = vpop.xlane.xlu0 %370 }
 0x16b   : > { %v372_v18 = vsub.f32 %v368_v11, %v371_v17 }
 0x16d   : > { %v373_v19 = vmul.f32 1.442695, %v372_v18 }
 0x16f   : > { %638 = vpow2.f32 %v373_v19 }
 0x17c   : > { %v639_v20 = vpop.eup %638 }
 0x17d   : > { %v375_v21 = vsel %vm316_vm1, %v639_v20, 0.0  ;;  %v378_v22 = vpack.c.bf16 %v639_v20, %v639_v20 }
 0x17e   : > { %376 = vadd.xlane.f32.xlu0 %v375_v21 }
 0x17f   : > { %593 = vmatmul.mubr.msk.bf16.vlgmr.msra.gmra.mxu1 %vm316_vm1, %v378_v22 }
 0x207   : > { %v377_v23 = vpop.xlane.xlu0 %376 }
 0x208   : > { %640 = vrcp.f32 %v377_v23 }
 0x215   : > { %v641_v24 = vpop.eup %640 }
 0x23f   : > { %v420_v25 = vpop.f32.mrf.mxu1 }
 0x240   : > { %v427_v26 = vmul.f32 %v641_v24, %v420_v25 }
 0x241   : > { %v594_v27 = vpop.f32.mrf.mxu1 }
 0x242   : > { %v428_v28 = vpack.c.bf16 %v427_v26, %v427_v26 }
 0x243   : > { %v423_v29 = vpop.f32.mrf.mxu1 }
 0x244   : > { %430 = vst.msk [vmem:[%s304_s13] sm:$0xf] %vm429_vm4, %v428_v28 }
 0x245   : > { %v595_v30 = vpop.f32.mrf.mxu1 }
 0x246 PF: > { %s14_s19 = sadd.s32 1, %s680_s19   ;;  %s785_s15 = smov %s672_s17 }
 0x247   : > { %p11_p7 = scmp.ge.s32.totalorder %s14_s19, 10   ;;  %s786_s16 = smov %s676_s18 }
 0x248   : > { %s787_s17 = smov %s790_s20  ;;  %s788_s18 = smov %s794_s21 }
 0x249   :  { %13 = sbr.rel (!%p11_p7) target bundleno = 3 (0x3), region = 75 }

// kernel: decoder_forward.23
= control target key start
LH: loop header
LB: loop body
LE: loop exit
PB: predicated region body
PF: predicated region fallthrough
CT: control target
= control target key end

     0   :  { %vm19_vm0 = vcmask 523264   ;;  %v198_v1 = vmov 0.0   ;;  %vm58_vm1 = vcmask 261120   ;;  %vm157_vm2 = vcmask 519168   ;;  %s254_s1 = inlined_call_operand.vmem [shape: bf16[32,64], index: 1, kind: input, shape index: {}]   ;;  %s255_s0 = inlined_call_operand.vmem [shape: bf16[32,32], index: 0, kind: input, shape index: {}]   ;;  %s256_s2 = inlined_call_operand.vmem [shape: f32[1,64], index: 2, kind: input, shape index: {}]   ;;  %s257_s3 = inlined_call_operand.vmem [shape: bf16[32,64], index: 3, kind: output, shape index: {}]  }
   0x1   :  { %v194_v0 = vld [vmem:[%s254_s1 + $0x8] sm:$0xff]   ;;  %22 = vst.msk [vmem:[#allocation2 + $0x10] sm:$0xff] %vm19_vm0, %v198_v1  ;;  %20 = vst.msk [vmem:[#allocation2] sm:$0xff] %vm19_vm0, %v198_v1  ;;  %v195_v2 = vld [vmem:[%s254_s1] sm:$0xff]  }
   0x2   :  { %21 = vst.msk [vmem:[#allocation2 + $0x8] sm:$0xff] %vm19_vm0, %v198_v1  ;;  %23 = vst.msk [vmem:[#allocation2 + $0x18] sm:$0xff] %vm19_vm0, %v198_v1  ;;  %185 = vmatprep.subr.bf16.mxu0 %v194_v0  ;;  %v196_v3 = vld [vmem:[%s255_s0] sm:$0xff]   ;;  %v197_v4 = vld [vmem:[%s255_s0 + $0x8] sm:$0xff]  }
   0x3   :  { %186 = vmatpush3.bf16.msra.mxu0 %v194_v0  ;;  %189 = vmatprep.mubr.msk.bf16.mxu0 %vm58_vm1, %v196_v3  ;;  %v172_v17 = vld [vmem:[%s256_s2] ss:$0 sm:$0xff] }
   0x4   :  { %187 = vmatprep.subr.bf16.mxu0 %v195_v2 }
   0x7   :  { %188 = vmatpush3.bf16.msra.mxu0 %v195_v2 }
   0x8   :  { %v30_v5 = vld [vmem:[#allocation2 + $0x10] sm:$0xff]  ;;  %v28_v7 = vld [vmem:[#allocation2] sm:$0xff] }
   0x9   :  { %v31_v10 = vld [vmem:[#allocation2 + $0x18] sm:$0xff]  ;;  %v29_v13 = vld [vmem:[#allocation2 + $0x8] sm:$0xff] }
   0xa   :  { %190 = vmatmul.mubr.msk.bf16.vlgmr.msra.gmra.mxu0 %vm58_vm1, %v197_v4 }
  0xca   :  { %v191_v6 = vpop.f32.mrf.mxu0 }
  0xcb   :  { %v116_v8 = vadd.f32 %v191_v6, %v30_v5 }
  0xcc   :  { %v99_v9 = vpop.f32.mrf.mxu0 }
  0xcd   :  { %121 = vst.msk [vmem:[#allocation2 + $0x10] sm:$0xff] %vm19_vm0, %v116_v8  ;;  %v114_v11 = vadd.f32 %v99_v9, %v28_v7 }
  0xce   :  { %v192_v12 = vpop.f32.mrf.mxu0 }
  0xcf   :  { %119 = vst.msk [vmem:[#allocation2] sm:$0xff] %vm19_vm0, %v114_v11  ;;  %v117_v14 = vadd.f32 %v192_v12, %v31_v10 }
  0xd0   :  { %v102_v15 = vpop.f32.mrf.mxu0 }
  0xd1   :  { %122 = vst.msk [vmem:[#allocation2 + $0x18] sm:$0xff] %vm19_vm0, %v117_v14  ;;  %v115_v16 = vadd.f32 %v102_v15, %v29_v13 }
  0xd3   :  { %120 = vst.msk [vmem:[#allocation2 + $0x8] sm:$0xff] %vm19_vm0, %v115_v16 }
  0xd4   :  { %v128_v18 = vld [vmem:[#allocation2 + $0x10] sm:$0xff] }
  0xd5   :  { %v139_v19 = vadd.f32 %v172_v17, %v128_v18 }
  0xd6   :  { %v126_v20 = vld [vmem:[#allocation2] sm:$0xff] }
  0xd7   :  { %v179_v21 = vpack.c.bf16 %v139_v19, %v139_v19  ;;  %v137_v22 = vadd.f32 %v172_v17, %v126_v20 }
  0xd8   :  { %v129_v23 = vld [vmem:[#allocation2 + $0x18] sm:$0xff] }
  0xd9   :  { %160 = vst.msk [vmem:[%s257_s3 + $0x8] sm:$0xf] %vm157_vm2, %v179_v21  ;;  %v177_v24 = vpack.c.bf16 %v137_v22, %v137_v22  ;;  %v140_v25 = vadd.f32 %v172_v17, %v129_v23 }
  0xda   :  { %v127_v26 = vld [vmem:[#allocation2 + $0x8] sm:$0xff] }
  0xdb   :  { %158 = vst.msk [vmem:[%s257_s3] sm:$0xf] %vm157_vm2, %v177_v24  ;;  %v180_v27 = vpack.c.bf16 %v140_v25, %v140_v25  ;;  %v138_v28 = vadd.f32 %v172_v17, %v127_v26 }
  0xdd   :  { %161 = vst.msk [vmem:[%s257_s3 + $0xc] sm:$0xf] %vm157_vm2, %v180_v27  ;;  %v178_v29 = vpack.c.bf16 %v138_v28, %v138_v28 }
  0xdf   :  { %159 = vst.msk [vmem:[%s257_s3 + $0x4] sm:$0xf] %vm157_vm2, %v178_v29 }

// kernel: decoder_forward.24
= control target key start
LH: loop header
LB: loop body
LE: loop exit
PB: predicated region body
PF: predicated region fallthrough
CT: control target
= control target key end

     0   :  { %s731_s15 = smov 0   ;;  %s733_s16 = smov 0   ;;  %s801_s0 = inlined_call_operand.vmem [shape: f32[2,1,16], index: 0, kind: input, shape index: {}]   ;;  %s802_s1 = inlined_call_operand.vmem [shape: bf16[2,4,8,8], index: 1, kind: input, shape index: {}]   ;;  %s803_s2 = inlined_call_operand.vmem [shape: bf16[2,4,16,8], index: 2, kind: input, shape index: {}]   ;;  %s804_s3 = inlined_call_operand.vmem [shape: bf16[2,4,16,8], index: 3, kind: input, shape index: {}]   ;;  %s805_s4 = inlined_call_operand.vmem [shape: bf16[2,4,8,8], index: 4, kind: output, shape index: {}]  }
   0x1   :  { %s735_s17 = smov 0   ;;  %s737_s18 = smov 0  }
   0x2   :  { %s739_s19 = smov 0  }
   0x3 LB: > { %s23_s20 = sadd.s32 1, %s694_s17  ;;  %s26_s21 = sadd.s32 1, %s698_s18  ;;  %s702_s19 = sphi %s739_s19, %s14_s19   ;;  %s698_s18 = sphi %s737_s18, %s809_s18   ;;  %s694_s17 = sphi %s735_s17, %s808_s17   ;;  %s690_s16 = sphi %s733_s16, %s807_s16   ;;  %s686_s15 = sphi %s731_s15, %s806_s15  }
   0x4   : > { %p24_p0 = scmp.ge.s32.totalorder %s23_s20, 4  ;;  %p582_p1 = scmp.ge.s32.totalorder %s702_s19, 1 }
   0x5   : > { %p221_p2 = scmp.lt.s32.totalorder %s702_s19, 9 }
   0x6   : > { %s811_s20 = smov (%p24_p0, %s23_s20), 0  ;;  %s813_s21 = smov (!%p24_p0, %s26_s21), %s698_s18 }
   0x7   : > { %p222_p3 = pnand %p582_p1, %p221_p2  ;;  %p28_p4 = scmp.ge.s32.totalorder %s813_s21, 2 }
   0x8   : > { %p274_p5 = scmp.lt.s32.totalorder (!%p222_p3), %s690_s16, 1  ;;  %p279_p6 = scmp.lt.s32.totalorder (!%p222_p3), %s686_s15, 3 }
   0x9   : > { %s815_s21 = smov (%p28_p4, %s813_s21), 0  ;;  %225 = sbr.rel (%p222_p3) target bundleno = 582 (0x246), region = 36 }
   0xe   : > { %v704_v0 = vmov 0.0   ;;  %vm705_vm0 = vmmov 0   ;;  %s817_s16 = smov (!%p274_p5, %s690_s16), 1  ;;  %s819_s15 = smov (!%p279_p6, %s686_s15), 3  ;;  %vm329_vm1 = vcmask 64512   ;;  %vm376_vm2 = vcmask 130048  }
   0xf   : > { %604 = vmatprep.subr.bf16.mxu0 %v704_v0  ;;  %606 = vmatprep.mubr.msk.bf16.mxu0 %vm705_vm0, %v704_v0  ;;  %s586_s22 = sshll.u32 %s817_s16, 3  ;;  %s583_s23 = sshll.u32 %s817_s16, 2  ;;  %vm439_vm3 = vcmask 60416  }
  0x10   : > { %610 = vmatprep.subr.bf16.mxu1 %v704_v0  ;;  %612 = vmatprep.mubr.msk.bf16.mxu1 %vm705_vm0, %v704_v0  ;;  %s585_s24 = sshll.u32 %s819_s15, 1  ;;  %s761_s27 = sadd.s32 %s583_s23, %s819_s15 }
  0x11   : > { %s291_s25 = sadd.s32 %s586_s22, %s585_s24  ;;  %s584_s5 = sshll.u32 %s761_s27, 2 }
  0x12   : > { %s587_s26 = sshll.u32 %s291_s25, 2  ;;  %s284_s8 = scalar_lea.vmem %s802_s1, %s584_s5 }
  0x13   : > { %s293_s30 = scalar_lea.vmem %s803_s2, %s587_s26  ;;  %v312_v3 = vld [vmem:[%s284_s8] sm:$0xf]  ;;  %s276_s11 = scalar_lea.vmem %s801_s0, %s817_s16 }
  0x14   : > { %v658_v1 = vld [vmem:[%s293_s30] sm:$0xff]   ;;  %s302_s14 = scalar_lea.vmem %s804_s3, %s587_s26  ;;  %s310_s22 = scalar_lea.vmem %s805_s4, %s584_s5 }
  0x15   : > { %v334_v2 = vsel %vm329_vm1, %v658_v1, 0  ;;  %v593_v4 = vld [vmem:[%s276_s11] ss:$0 sm:$0xff] }
  0x16   : > { %605 = vmatpush3.bf16.xpose.msra.mxu0 %v334_v2  ;;  %v659_v11 = vld [vmem:[%s302_s14] sm:$0xff]  }
  0x17   : > { %611 = vmatpush3.bf16.msra.mxu1 %v659_v11 }
  0x1d   : > { %607 = vmatmul.mubr.msk.bf16.vlgmr.msra.gmra.mxu0 %vm329_vm1, %v312_v3 }
  0xdd   : > { %v370_v5 = vpop.f32.mrf.mxu0 }
  0xde   : > { %v371_v6 = vadd.f32 %v593_v4, %v370_v5 }
  0xdf   : > { %v608_v7 = vpop.f32.mrf.mxu0 }
  0xe0   : > { %v377_v8 = vsel %vm376_vm2, %v371_v6, -inf }
  0xe1   : > { %v373_v9 = vpop.f32.mrf.mxu0  ;;  %378 = vmax.xlane.f32.xlu0 %v377_v8 }
  0xe3   : > { %v609_v10 = vpop.f32.mrf.mxu0 }
 0x16a   : > { %v379_v12 = vpop.xlane.xlu0 %378 }
 0x16b   : > { %v380_v13 = vsub.f32 %v371_v6, %v379_v12 }
 0x16d   : > { %v381_v14 = vmul.f32 1.442695, %v380_v13 }
 0x16f   : > { %660 = vpow2.f32 %v381_v14 }
 0x17c   : > { %v661_v15 = vpop.eup %660 }
 0x17d   : > { %v383_v16 = vsel %vm376_vm2, %v661_v15, 0.0  ;;  %v386_v17 = vpack.c.bf16 %v661_v15, %v661_v15 }
 0x17e   : > { %384 = vadd.xlane.f32.xlu0 %v383_v16 }
 0x17f   : > { %613 = vmatmul.mubr.msk.bf16.vlgmr.msra.gmra.mxu1 %vm376_vm2, %v386_v17 }
 0x207   : > { %v385_v18 = vpop.xlane.xlu0 %384 }
 0x208   : > { %662 = vrcp.f32 %v385_v18 }
 0x215   : > { %v663_v19 = vpop.eup %662 }
 0x23f   : > { %v430_v20 = vpop.f32.mrf.mxu1 }
 0x240   : > { %v437_v21 = vmul.f32 %v663_v19, %v430_v20 }
 0x241   : > { %v614_v22 = vpop.f32.mrf.mxu1 }
 0x242   : > { %v438_v23 = vpack.c.bf16 %v437_v21, %v437_v21 }
 0x243   : > { %v433_v24 = vpop.f32.mrf.mxu1 }
 0x244   : > { %440 = vst.msk [vmem:[%s310_s22] sm:$0xf] %vm439_vm3, %v438_v23 }
 0x245   : > { %v615_v25 = vpop.f32.mrf.mxu1 }
 0x246 PF: > { %s14_s19 = sadd.s32 1, %s702_s19   ;;  %s806_s15 = smov %s694_s17 }
 0x247   : > { %p11_p7 = scmp.ge.s32.totalorder %s14_s19, 10   ;;  %s807_s16 = smov %s698_s18 }
 0x248   : > { %s808_s17 = smov %s811_s20  ;;  %s809_s18 = smov %s815_s21 }
 0x249   :  { %13 = sbr.rel (!%p11_p7) target bundleno = 3 (0x3), region = 75 }

// kernel: decoder_forward.26
= control target key start
LH: loop header
LB: loop body
LE: loop exit
PB: predicated region body
PF: predicated region fallthrough
CT: control target
= control target key end

     0   :  { %vm32_vm0 = vcmask 261120   ;;  %v210_v15 = vmov 0.0   ;;  %vm211_vm1 = vmmov 0   ;;  %vm25_vm2 = vcmask 523264   ;;  %s275_s0 = inlined_call_operand.vmem [shape: bf16[16,32], index: 0, kind: input, shape index: {}]   ;;  %s276_s1 = inlined_call_operand.vmem [shape: bf16[32,64], index: 1, kind: input, shape index: {}]   ;;  %s277_s2 = inlined_call_operand.vmem [shape: f32[1,32], index: 2, kind: input, shape index: {}]   ;;  %s278_s3 = inlined_call_operand.vmem [shape: f32[1,32], index: 3, kind: input, shape index: {}]   ;;  %s279_s4 = inlined_call_operand.vmem [shape: f32[1,64], index: 4, kind: input, shape index: {}]   ;;  %s280_s5 = inlined_call_operand.vmem [shape: bf16[16,64], index: 5, kind: output, shape index: {}]  }
   0x1   :  { %v188_v0 = vld [vmem:[%s275_s0] sm:$0xff]   ;;  %194 = vmatprep.subr.bf16.mxu0 %v210_v15  ;;  %v204_v16 = vld [vmem:[%s276_s1 + $0x8] sm:$0xff]   ;;  %198 = vmatprep.mubr.msk.bf16.mxu0 %vm211_vm1, %v210_v15  ;;  %26 = vst.msk [vmem:[#allocation2] sm:$0xff] %vm25_vm2, %v210_v15  ;;  %27 = vst.msk [vmem:[#allocation2 + $0x8] sm:$0xff] %vm25_vm2, %v210_v15  ;;  %vm170_vm3 = vcmask 519168  }
   0x2   :  { %v189_v1 = vunpack.c.l.bf16 %v188_v0  ;;  %v190_v2 = vunpack.c.h.bf16 %v188_v0  ;;  %195 = vmatpush3.bf16.msra.mxu0 %v204_v16  ;;  %v205_v17 = vld [vmem:[%s276_s1] sm:$0xff]  }
   0x3   :  { %196 = vmatprep.subr.bf16.mxu0 %v210_v15  ;;  %v177_v26 = vld [vmem:[%s277_s2] ss:$0 sm:$0xff] }
   0x4   :  { %v33_v3 = vsel %vm32_vm0, %v189_v1, 0.0  ;;  %v36_v4 = vsel %vm32_vm0, %v190_v2, 0.0  ;;  %v178_v30 = vld [vmem:[%s278_s3] ss:$0 sm:$0xff] }
   0x5   :  { %34 = vadd.xlane.f32.xlu0 %v33_v3  ;;  %v182_v43 = vld [vmem:[%s279_s4] ss:$0 sm:$0xff] }
   0x6   :  { %197 = vmatpush3.bf16.msra.mxu0 %v205_v17 }
   0x8   :  { %v79_v35 = vld [vmem:[#allocation2] sm:$0xff]  ;;  %v80_v39 = vld [vmem:[#allocation2 + $0x8] sm:$0xff] }
   0x9   :  { %37 = vadd.xlane.f32.xlu0 %v36_v4 }
  0x8e   :  { %v35_v5 = vpop.xlane.xlu0 %34 }
  0x8f   :  { %v40_v6 = vmul.f32 0.03125, %v35_v5 }
  0x91   :  { %v42_v7 = vsub.f32 %v189_v1, %v40_v6 }
  0x92   :  { %v38_v8 = vpop.xlane.xlu0 %37 }
  0x93   :  { %v41_v9 = vmul.f32 0.03125, %v38_v8  ;;  %v44_v10 = vmul.f32 %v42_v7, %v42_v7 }
  0x95   :  { %v43_v11 = vsub.f32 %v190_v2, %v41_v9  ;;  %v46_v12 = vsel %vm32_vm0, %v44_v10, 0.0 }
  0x96   :  { %47 = vadd.xlane.f32.xlu1 %v46_v12 }
  0x97   :  { %v45_v13 = vmul.f32 %v43_v11, %v43_v11 }
  0x99   :  { %v49_v14 = vsel %vm32_vm0, %v45_v13, 0.0 }
  0x9a   :  { %50 = vadd.xlane.f32.xlu1 %v49_v14 }
 0x11f   :  { %v48_v18 = vpop.xlane.xlu1 %47 }
 0x120   :  { %v52_v19 = vmul.f32 0.03125, %v48_v18 }
 0x122   :  { %v54_v20 = vadd.f32 1e-05, %v52_v19 }
 0x123   :  { %v51_v21 = vpop.xlane.xlu1 %50 }
 0x124   :  { %206 = vrsqrt.f32 %v54_v20  ;;  %v53_v22 = vmul.f32 0.03125, %v51_v21 }
 0x126   :  { %v55_v23 = vadd.f32 1e-05, %v53_v22 }
 0x128   :  { %208 = vrsqrt.f32 %v55_v23 }
 0x131   :  { %v207_v24 = vpop.eup %206 }
 0x132   :  { %v58_v25 = vmul.f32 %v207_v24, %v42_v7 }
 0x134   :  { %v67_v29 = vmul.f32 %v177_v26, %v58_v25 }
 0x135   :  { %v209_v27 = vpop.eup %208 }
 0x136   :  { %v59_v28 = vmul.f32 %v209_v27, %v43_v11  ;;  %v76_v32 = vadd.f32 %v178_v30, %v67_v29 }
 0x138   :  { %v68_v31 = vmul.f32 %v177_v26, %v59_v28 }
 0x13a   :  { %v77_v33 = vadd.f32 %v178_v30, %v68_v31 }
 0x13c   :  { %v78_v34 = vpack.c.bf16 %v77_v33, %v76_v32 }
 0x13e   :  { %199 = vmatmul.mubr.msk.bf16.vlgmr.msra.gmra.mxu0 %vm32_vm0, %v78_v34 }
 0x1fe   :  { %v134_v36 = vpop.f32.mrf.mxu0 }
 0x1ff   :  { %v141_v37 = vadd.f32 %v134_v36, %v79_v35 }
 0x200   :  { %v200_v38 = vpop.f32.mrf.mxu0 }
 0x201   :  { %144 = vst.msk [vmem:[#allocation2] sm:$0xff] %vm25_vm2, %v141_v37 }
 0x202   :  { %v137_v40 = vpop.f32.mrf.mxu0 }
 0x203   :  { %v142_v41 = vadd.f32 %v137_v40, %v80_v39 }
 0x204   :  { %v201_v42 = vpop.f32.mrf.mxu0 }
 0x205   :  { %145 = vst.msk [vmem:[#allocation2 + $0x8] sm:$0xff] %vm25_vm2, %v142_v41 }
 0x208   :  { %v149_v44 = vld [vmem:[#allocation2] sm:$0xff] }
 0x209   :  { %v158_v45 = vadd.f32 %v182_v43, %v149_v44 }
 0x20b   :  { %v160_v46 = vmax.f32 %v158_v45, 0.0 }
 0x20c   :  { %v150_v47 = vld [vmem:[#allocation2 + $0x8] sm:$0xff] }
 0x20d   :  { %v185_v48 = vpack.c.bf16 %v160_v46, %v160_v46  ;;  %v159_v49 = vadd.f32 %v182_v43, %v150_v47 }
 0x20f   :  { %171 = vst.msk [vmem:[%s280_s5] sm:$0xf] %vm170_vm3, %v185_v48  ;;  %v161_v50 = vmax.f32 %v159_v49, 0.0 }
 0x211   :  { %v186_v51 = vpack.c.bf16 %v161_v50, %v161_v50 }
 0x213   :  { %172 = vst.msk [vmem:[%s280_s5 + $0x4] sm:$0xf] %vm170_vm3, %v186_v51 }

// kernel: decoder_forward.27
= control target key start
LH: loop header
LB: loop body
LE: loop exit
PB: predicated region body
PF: predicated region fallthrough
CT: control target
= control target key end

     0   :  { %vm22_vm0 = vcmask 261120   ;;  %v190_v0 = vmov 0.0   ;;  %vm191_vm1 = vmmov 0   ;;  %vm66_vm2 = vcmask 523264   ;;  %s248_s1 = inlined_call_operand.vmem [shape: bf16[64,32], index: 1, kind: input, shape index: {}]   ;;  %s249_s0 = inlined_call_operand.vmem [shape: bf16[16,64], index: 0, kind: input, shape index: {}]   ;;  %s250_s3 = inlined_call_operand.vmem [shape: bf16[16,32], index: 3, kind: input, shape index: {}]   ;;  %s251_s2 = inlined_call_operand.vmem [shape: f32[1,32], index: 2, kind: input, shape index: {}]   ;;  %s252_s4 = inlined_call_operand.vmem [shape: bf16[16,32], index: 4, kind: output, shape index: {}]  }
   0x1   :  { %171 = vmatprep.subr.bf16.mxu0 %v190_v0  ;;  %v185_v1 = vld [vmem:[%s248_s1 + $0x18] sm:$0xff]   ;;  %179 = vmatprep.mubr.msk.bf16.mxu0 %vm191_vm1, %v190_v0  ;;  %23 = vst.msk [vmem:[#allocation2] sm:$0xff] %vm22_vm0, %v190_v0  ;;  %24 = vst.msk [vmem:[#allocation2 + $0x8] sm:$0xff] %vm22_vm0, %v190_v0  ;;  %v186_v2 = vld [vmem:[%s248_s1 + $0x10] sm:$0xff]   ;;  %vm144_vm3 = vcmask 257024  }
   0x2   :  { %172 = vmatpush3.bf16.msra.mxu0 %v185_v1  ;;  %v187_v3 = vld [vmem:[%s248_s1 + $0x8] sm:$0xff]   ;;  %v188_v4 = vld [vmem:[%s248_s1] sm:$0xff]  }
   0x3   :  { %173 = vmatprep.subr.bf16.mxu0 %v190_v0  ;;  %v189_v5 = vld [vmem:[%s249_s0] sm:$0xff]  }
   0x4   :  { %v163_v13 = vld [vmem:[%s250_s3] sm:$0xff]  }
   0x5   :  { %v157_v15 = vld [vmem:[%s251_s2] ss:$0 sm:$0xff]  ;;  %v164_v16 = vunpack.c.l.bf16 %v163_v13  ;;  %v165_v20 = vunpack.c.h.bf16 %v163_v13 }
   0x6   :  { %174 = vmatpush3.bf16.msra.mxu0 %v186_v2 }
   0x7   :  { %175 = vmatprep.subr.bf16.mxu0 %v190_v0 }
   0x8   :  { %v27_v6 = vld [vmem:[#allocation2] sm:$0xff]  ;;  %v28_v10 = vld [vmem:[#allocation2 + $0x8] sm:$0xff] }
   0xa   :  { %176 = vmatpush3.bf16.msra.mxu0 %v187_v3 }
   0xb   :  { %177 = vmatprep.subr.bf16.mxu0 %v190_v0 }
   0xe   :  { %178 = vmatpush3.bf16.msra.mxu0 %v188_v4 }
  0x11   :  { %180 = vmatmul.mubr.msk.bf16.vlgmr.msra.gmra.mxu0 %vm66_vm2, %v189_v5 }
  0xd1   :  { %v104_v7 = vpop.f32.mrf.mxu0 }
  0xd2   :  { %v111_v8 = vadd.f32 %v104_v7, %v27_v6 }
  0xd3   :  { %v181_v9 = vpop.f32.mrf.mxu0 }
  0xd4   :  { %114 = vst.msk [vmem:[#allocation2] sm:$0xff] %vm22_vm0, %v111_v8 }
  0xd5   :  { %v107_v11 = vpop.f32.mrf.mxu0 }
  0xd6   :  { %v112_v12 = vadd.f32 %v107_v11, %v28_v10 }
  0xd7   :  { %v182_v14 = vpop.f32.mrf.mxu0 }
  0xd8   :  { %115 = vst.msk [vmem:[#allocation2 + $0x8] sm:$0xff] %vm22_vm0, %v112_v12 }
  0xdb   :  { %v119_v17 = vld [vmem:[#allocation2] sm:$0xff] }
  0xdc   :  { %v128_v18 = vadd.f32 %v157_v15, %v119_v17 }
  0xde   :  { %v134_v19 = vadd.f32 %v164_v16, %v128_v18 }
  0xdf   :  { %v120_v21 = vld [vmem:[#allocation2 + $0x8] sm:$0xff] }
  0xe0   :  { %v160_v22 = vpack.c.bf16 %v134_v19, %v134_v19  ;;  %v129_v23 = vadd.f32 %v157_v15, %v120_v21 }
  0xe2   :  { %145 = vst.msk [vmem:[%s252_s4] sm:$0xf] %vm144_vm3, %v160_v22  ;;  %v135_v24 = vadd.f32 %v165_v20, %v129_v23 }
  0xe4   :  { %v161_v25 = vpack.c.bf16 %v135_v24, %v135_v24 }
  0xe6   :  { %146 = vst.msk [vmem:[%s252_s4 + $0x4] sm:$0xf] %vm144_vm3, %v161_v25 }

// kernel: decoder_forward.37
= control target key start
LH: loop header
LB: loop body
LE: loop exit
PB: predicated region body
PF: predicated region fallthrough
CT: control target
= control target key end

     0   :  { %vm30_vm0 = vcmask 261120   ;;  %s279_s0 = inlined_call_operand.vmem [shape: bf16[16,32], index: 0, kind: input, shape index: {}]   ;;  %s280_s1 = inlined_call_operand.vmem [shape: bf16[32,64], index: 1, kind: input, shape index: {}]   ;;  %s281_s2 = inlined_call_operand.vmem [shape: f32[1,32], index: 2, kind: input, shape index: {}]   ;;  %s282_s3 = inlined_call_operand.vmem [shape: f32[1,32], index: 3, kind: input, shape index: {}]   ;;  %s283_s4 = inlined_call_operand.hbm [shape: f32[16,64], index: 4, kind: output, shape index: {}]  }
   0x1   :  { %v173_v0 = vld [vmem:[%s279_s0] sm:$0xff]  }
   0x2   :  { %v174_v1 = vunpack.c.l.bf16 %v173_v0  ;;  %v175_v2 = vunpack.c.h.bf16 %v173_v0 }
   0x3   :  { %9 = vsyncpa [#allocation4], 0  ;;  %v192_v15 = vld [vmem:[%s280_s1 + $0x8] sm:$0xff]   ;;  %v220_v16 = vmov 0.0   ;;  %vm221_vm1 = vmmov 0   ;;  %v193_v17 = vld [vmem:[%s280_s1] sm:$0xff]  }
   0x4   :  { %v31_v3 = vsel %vm30_vm0, %v174_v1, 0.0  ;;  %v34_v4 = vsel %vm30_vm0, %v175_v2, 0.0  ;;  %179 = vmatprep.subr.bf16.mxu0 %v220_v16  ;;  %183 = vmatprep.mubr.msk.bf16.mxu0 %vm221_vm1, %v220_v16  ;;  %vm23_vm2 = vcmask 523264   ;;  %v167_v26 = vld [vmem:[%s281_s2] ss:$0 sm:$0xff]  ;;  %s222_s2 = smov [#allocation3]  }
   0x5   :  { %32 = vadd.xlane.f32.xlu0 %v31_v3  ;;  %180 = vmatpush3.bf16.msra.mxu0 %v192_v15  ;;  %24 = vst.msk [vmem:[#allocation2] sm:$0xff] %vm23_vm2, %v220_v16  ;;  %25 = vst.msk [vmem:[#allocation2 + $0x8] sm:$0xff] %vm23_vm2, %v220_v16  ;;  %v168_v30 = vld [vmem:[%s282_s3] ss:$0 sm:$0xff]  ;;  %s156_s3 = sshll.u32 %s222_s2, 4  ;;  %s157_s3 = int_to_ptr.vmem [resolvable:$true] %s156_s3 }
   0x6   :  { %181 = vmatprep.subr.bf16.mxu0 %v220_v16  ;;  %s198_s23 = scalar_lea.vmem %s157_s3, 256  ;;  %p203_p1 = scmp.lt.s32.totalorder %s157_s3, %s157_s3 }
   0x7   :  { %p199_p0 = scmp.ne.s32.totalorder %s157_s3, %s198_s23  ;;  %p204_p2 = scmp.lt.s32.totalorder %s198_s23, %s198_s23 }
   0x9   :  { %35 = vadd.xlane.f32.xlu0 %v34_v4  ;;  %182 = vmatpush3.bf16.msra.mxu0 %v193_v17  ;;  %p205_p3 = por %p204_p2, %p203_p1 }
   0xb   :  { %p206_p4 = pnand %p205_p3, %p199_p0 }
   0xc   :  { %v77_v35 = vld [vmem:[#allocation2] sm:$0xff]  ;;  %v78_v39 = vld [vmem:[#allocation2 + $0x8] sm:$0xff] }
  0x8e   :  { %v33_v5 = vpop.xlane.xlu0 %32 }
  0x8f   :  { %v38_v6 = vmul.f32 0.03125, %v33_v5 }
  0x91   :  { %v40_v7 = vsub.f32 %v174_v1, %v38_v6 }
  0x92   :  { %v36_v8 = vpop.xlane.xlu0 %35 }
  0x93   :  { %v39_v9 = vmul.f32 0.03125, %v36_v8  ;;  %v42_v10 = vmul.f32 %v40_v7, %v40_v7 }
  0x95   :  { %v41_v11 = vsub.f32 %v175_v2, %v39_v9  ;;  %v44_v12 = vsel %vm30_vm0, %v42_v10, 0.0 }
  0x96   :  { %45 = vadd.xlane.f32.xlu1 %v44_v12 }
  0x97   :  { %v43_v13 = vmul.f32 %v41_v11, %v41_v11 }
  0x99   :  { %v47_v14 = vsel %vm30_vm0, %v43_v13, 0.0 }
  0x9a   :  { %48 = vadd.xlane.f32.xlu1 %v47_v14 }
 0x11f   :  { %v46_v18 = vpop.xlane.xlu1 %45 }
 0x120   :  { %v50_v19 = vmul.f32 0.03125, %v46_v18 }
 0x122   :  { %v52_v20 = vadd.f32 1e-05, %v50_v19 }
 0x123   :  { %v49_v21 = vpop.xlane.xlu1 %48 }
 0x124   :  { %194 = vrsqrt.f32 %v52_v20  ;;  %v51_v22 = vmul.f32 0.03125, %v49_v21 }
 0x126   :  { %v53_v23 = vadd.f32 1e-05, %v51_v22 }
 0x128   :  { %196 = vrsqrt.f32 %v53_v23 }
 0x131   :  { %v195_v24 = vpop.eup %194 }
 0x132   :  { %v56_v25 = vmul.f32 %v195_v24, %v40_v7 }
 0x134   :  { %v65_v29 = vmul.f32 %v167_v26, %v56_v25 }
 0x135   :  { %v197_v27 = vpop.eup %196 }
 0x136   :  { %v57_v28 = vmul.f32 %v197_v27, %v41_v11  ;;  %v74_v32 = vadd.f32 %v168_v30, %v65_v29 }
 0x138   :  { %v66_v31 = vmul.f32 %v167_v26, %v57_v28 }
 0x13a   :  { %v75_v33 = vadd.f32 %v168_v30, %v66_v31 }
 0x13c   :  { %v76_v34 = vpack.c.bf16 %v75_v33, %v74_v32 }
 0x13e   :  { %184 = vmatmul.mubr.msk.bf16.vlgmr.msra.gmra.mxu0 %vm30_vm0, %v76_v34 }
 0x1fe   :  { %v132_v36 = vpop.f32.mrf.mxu0 }
 0x1ff   :  { %v139_v37 = vadd.f32 %v132_v36, %v77_v35 }
 0x200   :  { %v185_v38 = vpop.f32.mrf.mxu0 }
 0x201   :  { %142 = vst.msk [vmem:[#allocation2] sm:$0xff] %vm23_vm2, %v139_v37 }
 0x202   :  { %v135_v40 = vpop.f32.mrf.mxu0 }
 0x203   :  { %v140_v41 = vadd.f32 %v135_v40, %v78_v39 }
 0x204   :  { %v186_v42 = vpop.f32.mrf.mxu0 }
 0x205   :  { %143 = vst.msk [vmem:[#allocation2 + $0x8] sm:$0xff] %vm23_vm2, %v140_v41 }
 0x208   :  { %v147_v43 = vld [vmem:[#allocation2] sm:$0xff] }
 0x209   :  { %149 = vst.msk [vmem:[#allocation3] sm:$0xff] %vm23_vm2, %v147_v43 }
 0x20c   :  { %v148_v44 = vld [vmem:[#allocation2 + $0x8] sm:$0xff] }
 0x20d   :  { %150 = vst.msk [vmem:[#allocation3 + $0x8] sm:$0xff] %vm23_vm2, %v148_v44 }
 0x20e   :  { %209 = shalt.err (!%p206_p4)
}
 0x20f   :  { %s223_s24 = smov 128   ;;  %s224_s25 = smov 8  }
 0x210   :  { %162 = dma.vmem_to_hbm [thread:$0]  %s157_s3, 256, %s283_s4, [#allocation4], %s223_s24, %s223_s24, %s224_s25  }
 0x211   :  { %218 = dma.done.wait [#allocation4], 256  }
 0x212   :  { %219 = vsyncadd [#allocation4], 4294967040 }
 0x213   :  { %166 = vsyncpa [#allocation4], 1 }

</bundles_post_ra>
